<compile_context>
chip_gen: v7x
topology: tpu7x:2x2x1
jax: 0.10.0
libtpu: 0.0.40
codegen_flags: <defaults>
</compile_context>

<pallas_src>
import functools

import jax
import jax.numpy as jnp
import numpy as np
from jax.experimental import pallas as pl
from jax.experimental.pallas import tpu as pltpu


def _round_up(x, m):
    return ((x + m - 1) // m) * m


def _opt_pos_enc_kernel(coords_ref, code_t_ref, out_ref, *, code_num, use_bf16):
    # coords_ref: (TP, Fp) f32   code_t_ref: (Fp*K, Cp) f32   out_ref: (TP, Cp)
    tp, fp = coords_ref.shape
    kc = fp * code_num

    # Map coords [-1, 1] -> grid coordinate [0, K-1]; clamp for edge safety
    # (in-range coords unaffected).
    x = (coords_ref[...] + 1.0) * ((code_num - 1) * 0.5)            # (TP, Fp)
    x = jnp.clip(x, 0.0, float(code_num - 1))

    # Lane-dense weight slab: column j = d*K + k holds relu(1 - |x_pd - k|).
    x_rep = jnp.repeat(x, code_num, axis=1)                         # (TP, Fp*K)
    col = jax.lax.broadcasted_iota(jnp.int32, (tp, kc), 1)          # (TP, Fp*K)
    k = (col % code_num).astype(jnp.float32)
    w = jnp.maximum(1.0 - jnp.abs(x_rep - k), 0.0)                  # (TP, Fp*K)

    code = code_t_ref[...]                                          # (Fp*K, Cp)
    if use_bf16:
        # v5e fast path: bf16 MXU inputs, f32 accumulation (looser tolerance).
        w = w.astype(jnp.bfloat16)
        code = code.astype(jnp.bfloat16)

    out_ref[...] = jnp.dot(
        w, code, preferred_element_type=jnp.float32).astype(out_ref.dtype)


def opt_pos_enc_forward(coords, shape_code, code_num, *,
                        tile_pts=512, use_bf16=False):
    """coords: (1, N, F) f32; shape_code: (C, F*code_num) f32 -> (1, N, C)."""
    b, n, f = coords.shape
    assert b == 1, "OptPosEnc broadcasting only supports batch size 1"
    c = shape_code.shape[0]
    assert shape_code.shape[1] == f * code_num

    # Contraction padding: F*K -> multiple of 256 (full v6e/v7x MXU pass) when
    # that can be expressed as extra (zeroed) coordinate dims.
    kc = f * code_num
    kc_pad = _round_up(kc, 256)
    if kc_pad % code_num == 0:
        f_pad = kc_pad // code_num
    else:
        f_pad, kc_pad = f, kc          # fall back: no contraction padding

    # Lane-dense output: pad channels to a multiple of 128 (unmasked stores).
    c_pad = _round_up(c, 128)

    # Point tiling: big tiles (amortize per-step overhead) but keep >= 2 grid
    # steps so both v7x TensorCores get work under "parallel" semantics.
    tile = max(8, (min(tile_pts, _round_up(n, 8)) // 8) * 8)
    if n < 2 * tile and n >= 16:
        tile = max(8, _round_up(-(-n // 2), 8))
    n_pad = _round_up(n, tile)

    coords2d = coords.reshape(n, f).astype(jnp.float32)
    # Padded coord dims / rows only ever multiply zero-padded code rows, so
    # they contribute exactly 0 to the output.
    coords2d = jnp.pad(coords2d, ((0, n_pad - n), (0, f_pad - f)))

    code_t = shape_code.T.astype(jnp.float32)                       # (F*K, C)
    code_t = jnp.pad(code_t, ((0, kc_pad - kc), (0, c_pad - c)))    # (Kc_p, C_p)

    out2d = pl.pallas_call(
        functools.partial(_opt_pos_enc_kernel,
                          code_num=code_num, use_bf16=use_bf16),
        out_shape=jax.ShapeDtypeStruct((n_pad, c_pad), jnp.float32),
        grid_spec=pltpu.PrefetchScalarGridSpec(
            num_scalar_prefetch=0,
            grid=(n_pad // tile,),
            in_specs=[
                pl.BlockSpec((tile, f_pad), lambda i: (i, 0)),
                # Grid-invariant code table (loaded once, reused every step).
                # TODO(synk): on v7x with much larger code tables, single-buffer
                # this spec (pipeline_mode=pl.Buffered(1)) to halve its VMEM use.
                pl.BlockSpec((kc_pad, c_pad), lambda i: (0, 0)),
            ],
            out_specs=pl.BlockSpec((tile, c_pad), lambda i: (i, 0)),
        ),
        compiler_params=pltpu.CompilerParams(
            dimension_semantics=("parallel",)),
    )(coords2d, code_t)

    return out2d[:n, :c][None]                                      # (1, N, C)


def ref_forward(coords, shape_code, code_num):
    """Pure-JAX mirror of the PyTorch gather-based forward (B = 1)."""
    _, n, f = coords.shape
    x = (coords + 1.0) * ((code_num - 1) / 2.0)                     # (1, N, F)
    corners = jnp.floor(x)[..., None] + jnp.array([0.0, 1.0])       # (1, N, F, 2)
    mul = (jnp.arange(f) * code_num)[None, None, :, None]           # (1, 1, F, 1)
    index = corners.astype(jnp.int32) + mul                         # (1, N, F, 2)
    index = jnp.clip(index, 0, shape_code.shape[1] - 1)
    weights = 1.0 - jnp.abs(x[..., None] - corners)                 # (1, N, F, 2)
    gathered = shape_code[:, index.reshape(-1)]                     # (C, N*F*2)
    gathered = gathered.reshape(-1, n, f, 2)                        # (C, N, F, 2)
    out = jnp.sum(gathered * weights, axis=(-2, -1))                # (C, N)
    return out.T[None]                                              # (1, N, C)


if __name__ == "__main__":
    # Small, deterministic setup.
    in_features = 3
    code_num = 64
    code_channel = 64
    pt_num = 256

    key = jax.random.PRNGKey(0)
    k_code, k_coords = jax.random.split(key)

    # Xavier-uniform init for shape_code: bound = sqrt(6 / (fan_in + fan_out)).
    fan_in = in_features * code_num
    fan_out = code_channel
    bound = float(np.sqrt(6.0 / (fan_in + fan_out)))
    shape_code = jax.random.uniform(
        k_code, (code_channel, in_features * code_num),
        dtype=jnp.float32, minval=-bound, maxval=bound)

    # Coordinates in [-1, 1) (open on the right, matching valid index range).
    coords = jax.random.uniform(
        k_coords, (1, pt_num, in_features),
        dtype=jnp.float32, minval=-1.0, maxval=0.999)

    out = opt_pos_enc_forward(coords, shape_code, code_num)
    out = jax.block_until_ready(out)

    expected = jax.block_until_ready(ref_forward(coords, shape_code, code_num))

    assert out.shape == (1, pt_num, code_channel), out.shape
    np.testing.assert_allclose(np.asarray(out), np.asarray(expected),
                               rtol=1e-5, atol=1e-5)
    print("KERNEL_OK")
</pallas_src>

<mosaic_0001>
module attributes {stable_mosaic.version = 11 : i64} {
  func.func @_opt_pos_enc_kernel(%arg0: i32, %arg1: memref<128x4xf32, #tpu.memory_space<vmem>>, %arg2: memref<256x128xf32, #tpu.memory_space<vmem>>, %arg3: memref<128x128xf32, #tpu.memory_space<vmem>>) attributes {dimension_semantics = [#tpu.dimension_semantics<parallel>], iteration_bounds = array<i64: 2>, scalar_prefetch = 0 : i64, scratch_operands = 0 : i64, tpu.core_type = #tpu.core_type<tc>, window_params = [{transform_indices = @transform_0, window_bounds = array<i64: 128, 4>}, {pipeline_mode = #tpu.pipeline_mode<synchronous>, transform_indices = @transform_1, window_bounds = array<i64: 256, 128>}, {transform_indices = @transform_2, window_bounds = array<i64: 128, 128>}]} {
    %c0 = arith.constant 0 : index
    %c0_0 = arith.constant 0 : index
    %0 = vector.load %arg1[%c0, %c0_0] : memref<128x4xf32, #tpu.memory_space<vmem>>, vector<128x4xf32>
    %cst = arith.constant 1.000000e+00 : f32
    %1 = vector.broadcast %cst : f32 to vector<128x4xf32>
    %2 = arith.addf %0, %1 : vector<128x4xf32>
    %cst_1 = arith.constant 3.150000e+01 : f32
    %3 = vector.broadcast %cst_1 : f32 to vector<128x4xf32>
    %4 = arith.mulf %2, %3 : vector<128x4xf32>
    %cst_2 = arith.constant 0.000000e+00 : f32
    %cst_3 = arith.constant 6.300000e+01 : f32
    %5 = vector.broadcast %cst_2 : f32 to vector<128x4xf32>
    %6 = arith.maximumf %5, %4 : vector<128x4xf32>
    %7 = vector.broadcast %cst_3 : f32 to vector<128x4xf32>
    %8 = arith.minimumf %7, %6 : vector<128x4xf32>
    %9 = vector.shape_cast %8 : vector<128x4xf32> to vector<128x4x1xf32>
    %10 = vector.broadcast %9 : vector<128x4x1xf32> to vector<128x4x64xf32>
    %11 = vector.shape_cast %10 : vector<128x4x64xf32> to vector<128x256xf32>
    %12 = tpu.iota {dimensions = array<i32: 1>} : vector<128x256xi32>
    %c64_i32 = arith.constant 64 : i32
    %c0_i32 = arith.constant 0 : i32
    %13 = arith.cmpi eq, %c64_i32, %c0_i32 : i32
    %c1_i32 = arith.constant 1 : i32
    %14 = arith.select %13, %c1_i32, %c64_i32 : i32
    %15 = vector.broadcast %14 : i32 to vector<128x256xi32>
    %16 = arith.remsi %12, %15 : vector<128x256xi32>
    %c0_i32_4 = arith.constant 0 : i32
    %17 = vector.broadcast %c0_i32_4 : i32 to vector<128x256xi32>
    %18 = arith.cmpi ne, %16, %17 : vector<128x256xi32>
    %c0_i32_5 = arith.constant 0 : i32
    %19 = vector.broadcast %c0_i32_5 : i32 to vector<128x256xi32>
    %20 = arith.cmpi slt, %16, %19 : vector<128x256xi32>
    %c0_i32_6 = arith.constant 0 : i32
    %21 = arith.cmpi slt, %14, %c0_i32_6 : i32
    %22 = vector.broadcast %21 : i1 to vector<128x256xi1>
    %23 = vector.broadcast %22 : vector<128x256xi1> to vector<128x256xi1>
    %24 = arith.xori %20, %23 : vector<128x256xi1>
    %25 = arith.andi %24, %18 : vector<128x256xi1>
    %26 = vector.broadcast %14 : i32 to vector<128x256xi32>
    %27 = arith.addi %16, %26 : vector<128x256xi32>
    %28 = arith.select %25, %27, %16 : vector<128x256xi1>, vector<128x256xi32>
    %29 = arith.sitofp %28 : vector<128x256xi32> to vector<128x256xf32>
    %30 = arith.subf %11, %29 : vector<128x256xf32>
    %31 = math.absf %30 : vector<128x256xf32>
    %cst_7 = arith.constant 1.000000e+00 : f32
    %32 = vector.broadcast %cst_7 : f32 to vector<128x256xf32>
    %33 = arith.subf %32, %31 : vector<128x256xf32>
    %cst_8 = arith.constant 0.000000e+00 : f32
    %34 = vector.broadcast %cst_8 : f32 to vector<128x256xf32>
    %35 = arith.maximumf %33, %34 : vector<128x256xf32>
    %c0_9 = arith.constant 0 : index
    %c0_10 = arith.constant 0 : index
    %36 = vector.load %arg2[%c0_9, %c0_10] : memref<256x128xf32, #tpu.memory_space<vmem>>, vector<256x128xf32>
    %cst_11 = arith.constant dense<0.000000e+00> : vector<128x128xf32>
    %37 = tpu.matmul %35, %36, %cst_11 {dimension_numbers = #tpu.dot_dimension_numbers<[1], [0], [0], [1], [0, 0, 1, 1], [], []>} : vector<128x256xf32>, vector<256x128xf32>, vector<128x128xf32> -> vector<128x128xf32>
    %c0_12 = arith.constant 0 : index
    %c0_13 = arith.constant 0 : index
    %38 = vector.load %arg3[%c0_12, %c0_13] : memref<128x128xf32, #tpu.memory_space<vmem>>, vector<128x128xf32>
    tpu.vector_store %arg3[%c0_12, %c0_13], %37 {strides = array<i32>} : memref<128x128xf32, #tpu.memory_space<vmem>>, vector<128x128xf32>,
    return
  }
  func.func @transform_0(%arg0: i32) -> (i32, i32) {
    %c0_i32 = arith.constant 0 : i32
    %c0_i32_0 = arith.constant 0 : i32
    return %arg0, %c0_i32 : i32, i32
  }
  func.func @transform_1(%arg0: i32) -> (i32, i32) {
    %c0_i32 = arith.constant 0 : i32
    %c0_i32_0 = arith.constant 0 : i32
    %c0_i32_1 = arith.constant 0 : i32
    return %c0_i32, %c0_i32_0 : i32, i32
  }
  func.func @transform_2(%arg0: i32) -> (i32, i32) {
    %c0_i32 = arith.constant 0 : i32
    %c0_i32_0 = arith.constant 0 : i32
    return %arg0, %c0_i32 : i32, i32
  }
}

</mosaic_0001>

<bundles_post_ra>
// kernel: tpu_custom_call.1
= control target key start
LH: loop header
LB: loop body
LE: loop exit
PB: predicated region body
PF: predicated region fallthrough
CT: control target
= control target key end

     0   :  { %7 = vsyncpa [#allocation3], 0  ;;  %s4067_s0 = inlined_call_operand.vmem [shape: f32[256,4], index: 0, kind: input, shape index: {}]   ;;  %s4068_s1 = inlined_call_operand.vmem [shape: f32[256,128], index: 1, kind: input, shape index: {}]   ;;  %s4069_s2 = inlined_call_operand.hbm [shape: f32[256,128], index: 2, kind: output, shape index: {}]  }
   0x1   :  { %9 = vsyncpa [#allocation3 + $0x1], 0  ;;  %s3066_s9 = smov 0   ;;  %s3068_s10 = smov 0  }
   0x2   :  { %s3070_s11 = smov 0   ;;  %s3072_s12 = smov 0  }
   0x3 LB: > { %s3087_s13 = sadd.s32 4294967295, %s3043_s12   ;;  %s2796_s14 = sadd.s32 4294967294, %s3043_s12   ;;  %s3043_s12 = sphi %s3072_s12, %s4164_s12   ;;  %s3039_s11 = sphi %s3070_s11, %s4163_s11   ;;  %s3035_s10 = sphi %s3068_s10, %s4162_s10   ;;  %s3031_s9 = sphi %s3066_s9, %s4161_s9  }
   0x4   : > { %s3091_s15 = sadd.s32 1, %s3043_s12   ;;  %s69_s16 = sadd.s32 1, %s3039_s11 }
   0x5   : > { %s66_s17 = ssub.s32 %s3043_s12, %s3091_s15  ;;  %p79_p0 = scmp.ne.s32.totalorder %s3039_s11, %s3035_s10 }
   0x6   : > { %p67_p1 = scmp.eq.s32.totalorder %s66_s17, 0  ;;  %p80_p2 = scmp.eq.s32.totalorder %s3087_s13, 1 }
   0x7   : > { %p85_p3 = scmp.ne.s32.totalorder %s3035_s10, %s3031_s9  ;;  %p86_p4 = scmp.eq.s32.totalorder %s2796_s14, 1 }
   0x8   : > { %s3102_s18 = scalar_select %p67_p1, %s3039_s11, %s69_s16  }
   0x9   : > { %p3104_p5 = por %p80_p2, %p79_p0  ;;  %p3108_p6 = por %p86_p4, %p85_p3 }
   0xa   : > { %p2799_p7 = scmp.ge.s32.totalorder %s3043_s12, 1  ;;  %p116_p8 = scmp.lt.s32.totalorder %s3043_s12, 3 }
   0xc   : > { %p117_p9 = pnand %p2799_p7, %p116_p8 }
   0xe   : > { %120 = sbr.rel (%p117_p9) target bundleno = 773 (0x305), region = 28 }
  0x15   : > { %s2801_s21 = sshll.u32 %s3087_s13, 4  ;;  %v4070_v0 = vlaneseq  ;;  %s3047_s5 = smov 64   ;;  %vm2337_vm0 = vcmask 523264  }
  0x16   : > { %p139_p10 = scmp.lt.s32.totalorder %s2801_s21, 31  ;;  %s135_s6 = sand.u32 1, %s3035_s10  }
  0x17   : > { %v3122_v3 = vshrl.u32 %v4070_v0, 7  ;;  %s2800_s7 = sshll.u32 %s135_s6, 7  ;;  %s2808_s14 = sshll.u32 %s3087_s13, 11 }
  0x18   : > { %s4166_s21 = smov (!%p139_p10, %s2801_s21), 31  ;;  %s3997_s8 = scalar_lea.vmem [#allocation2], %s2800_s7 }
  0x19   : > { %s2802_s22 = sshll.u32 %s4166_s21, 3  ;;  %v3126_v7 = vsub.s32 2, %v3122_v3  ;;  %v3129_v8 = vsub.s32 0, %v3122_v3  ;;  %v3132_v10 = vsub.s32 3, %v3122_v3  ;;  %v3135_v11 = vsub.s32 1, %v3122_v3  ;;  %s2734_s16 = sshll.u32 %s3997_s8, 4  ;;  %s4021_s16 = int_to_ptr.vmem [resolvable:$true] %s2734_s16 }
  0x1a   : > { %s3118_s25 = scalar_lea.vmem %s4067_s0, %s2802_s22  ;;  %v3140_v15 = vsub.s32 5, %v3122_v3  ;;  %v3145_v18 = vsub.s32 4, %v3122_v3  ;;  %v3148_v20 = vsub.s32 7, %v3122_v3  ;;  %v3153_v23 = vsub.s32 6, %v3122_v3  ;;  %s4019_s22 = scalar_lea.hbm %s4069_s2, %s2808_s14 }
  0x1b   : > { %v145_v1 = vld [vmem:[%s3118_s25] sm:$0xff]  ;;  %v146_v28 = vld [vmem:[%s3118_s25 + $0x8] sm:$0xff]  ;;  %v147_v54 = vld [vmem:[%s3118_s25 + $0x10] sm:$0xff]  ;;  %s4026_s23 = scalar_lea.sflag [#allocation3], %s135_s6  ;;  %s2981_s24 = scalar_lea.vmem %s4021_s16, 2048 }
  0x1c   : > { %v161_v2 = vadd.f32 1.0, %v145_v1  ;;  %v153_v5 = vld [vmem:[%s3118_s25 + $0x40] sm:$0xff]  ;;  %v162_v31 = vadd.f32 1.0, %v146_v28  ;;  %v154_v41 = vld [vmem:[%s3118_s25 + $0x48] sm:$0xff]  ;;  %v163_v57 = vadd.f32 1.0, %v147_v54  ;;  %p2982_p11 = scmp.ne.s32.totalorder %s4021_s16, %s2981_s24  ;;  %s3048_s13 = smov [#allocation2]  }
  0x1d   : > { %v169_v12 = vadd.f32 1.0, %v153_v5  ;;  %v170_v44 = vadd.f32 1.0, %v154_v41  ;;  %v155_v5 = vld [vmem:[%s3118_s25 + $0x50] sm:$0xff] }
  0x1e   : > { %v177_v4 = vmul.f32 31.5, %v161_v2  ;;  %v178_v34 = vmul.f32 31.5, %v162_v31  ;;  %v179_v60 = vmul.f32 31.5, %v163_v57  ;;  %p2983_p12 = pnand %p2982_p11, %p3104_p5 }
  0x1f   : > { %v185_v19 = vmul.f32 31.5, %v169_v12  ;;  %v186_v47 = vmul.f32 31.5, %v170_v44  ;;  %v171_v12 = vadd.f32 1.0, %v155_v5 }
  0x20   : > { %v193_v6 = vmax.f32 %v177_v4, 0.0  ;;  %v194_v37 = vmax.f32 %v178_v34, 0.0  ;;  %v195_v63 = vmax.f32 %v179_v60, 0.0  ;;  %p2984_p13 = pneg %p2983_p12 }
  0x21   : > { %v201_v24 = vmax.f32 %v185_v19, 0.0  ;;  %v202_v50 = vmax.f32 %v186_v47, 0.0 }
  0x22   : > { %v209_v9 = vmin.f32 %v193_v6, 63.0  ;;  %v210_v40 = vmin.f32 %v194_v37, 63.0  ;;  %v211_v4 = vmin.f32 %v195_v63, 63.0 }
  0x23   : > { %v217_v27 = vmin.f32 %v201_v24, 63.0  ;;  %v218_v53 = vmin.f32 %v202_v50, 63.0 }
  0x24   : > { %v242_v13 = vrot.slane %v209_v9, %v3126_v7  ;;  %v228_v14 = vrot.slane %v209_v9, %v3129_v8  ;;  %v249_v16 = vrot.slane %v209_v9, %v3132_v10  ;;  %v235_v17 = vrot.slane %v209_v9, %v3135_v11 }
  0x25   : > { %v263_v21 = vrot.slane %v209_v9, %v3140_v15  ;;  %v256_v22 = vrot.slane %v209_v9, %v3145_v18  ;;  %v277_v25 = vrot.slane %v209_v9, %v3148_v20  ;;  %v270_v26 = vrot.slane %v209_v9, %v3153_v23 }
  0x26   : > { %244 = vbcast.lane.b32.xlu1 %v242_v13, 256  ;;  %230 = vbcast.lane.b32.xlu0 %v228_v14, 256  ;;  %v683_v29 = vrot.slane %v217_v27, %v3135_v11  ;;  %v676_v30 = vrot.slane %v217_v27, %v3129_v8  ;;  %v697_v32 = vrot.slane %v217_v27, %v3132_v10 }
  0x27   : > { %v690_v33 = vrot.slane %v217_v27, %v3126_v7  ;;  %v711_v35 = vrot.slane %v217_v27, %v3140_v15  ;;  %v704_v36 = vrot.slane %v217_v27, %v3145_v18  ;;  %v725_v38 = vrot.slane %v217_v27, %v3148_v20 }
  0x28   : > { %v718_v39 = vrot.slane %v217_v27, %v3153_v23  ;;  %v291_v42 = vrot.slane %v210_v40, %v3135_v11  ;;  %v284_v43 = vrot.slane %v210_v40, %v3129_v8  ;;  %v305_v45 = vrot.slane %v210_v40, %v3132_v10 }
  0x29   : > { %v298_v46 = vrot.slane %v210_v40, %v3126_v7  ;;  %v319_v48 = vrot.slane %v210_v40, %v3140_v15  ;;  %v312_v49 = vrot.slane %v210_v40, %v3145_v18  ;;  %v333_v51 = vrot.slane %v210_v40, %v3148_v20 }
  0x2a   : > { %251 = vbcast.lane.b32.xlu1 %v249_v16, 256  ;;  %237 = vbcast.lane.b32.xlu0 %v235_v17, 256  ;;  %v326_v52 = vrot.slane %v210_v40, %v3153_v23  ;;  %v739_v55 = vrot.slane %v218_v53, %v3135_v11  ;;  %v732_v56 = vrot.slane %v218_v53, %v3129_v8  ;;  %v187_v16 = vmul.f32 31.5, %v171_v12 }
  0x2b   : > { %v753_v58 = vrot.slane %v218_v53, %v3132_v10  ;;  %v746_v59 = vrot.slane %v218_v53, %v3126_v7  ;;  %v767_v61 = vrot.slane %v218_v53, %v3140_v15  ;;  %v760_v62 = vrot.slane %v218_v53, %v3145_v18 }
  0x2c   : > { %v781_v1 = vrot.slane %v218_v53, %v3148_v20  ;;  %v774_v2 = vrot.slane %v218_v53, %v3153_v23  ;;  %v347_v6 = vrot.slane %v211_v4, %v3135_v11  ;;  %v340_v9 = vrot.slane %v211_v4, %v3129_v8 }
  0x2d   : > { %v361_v13 = vrot.slane %v211_v4, %v3132_v10  ;;  %v354_v14 = vrot.slane %v211_v4, %v3126_v7  ;;  %v375_v17 = vrot.slane %v211_v4, %v3140_v15  ;;  %v368_v19 = vrot.slane %v211_v4, %v3145_v18 }
  0x2e   : > { %265 = vbcast.lane.b32.xlu1 %v263_v21, 256  ;;  %258 = vbcast.lane.b32.xlu0 %v256_v22, 256  ;;  %v203_v21 = vmax.f32 %v187_v16, 0.0  ;;  %v389_v22 = vrot.slane %v211_v4, %v3148_v20  ;;  %v382_v24 = vrot.slane %v211_v4, %v3153_v23  ;;  %v3046_v16 = vmov 1934713408  }
  0x32   : > { %279 = vbcast.lane.b32.xlu1 %v277_v25, 256  ;;  %272 = vbcast.lane.b32.xlu0 %v270_v26, 256  ;;  %v219_v25 = vmin.f32 %v203_v21, 63.0  ;;  %v148_v26 = vld [vmem:[%s3118_s25 + $0x18] sm:$0xff] }
  0x34   : > { %v795_v27 = vrot.slane %v219_v25, %v3135_v11  ;;  %v788_v28 = vrot.slane %v219_v25, %v3129_v8  ;;  %v802_v31 = vrot.slane %v219_v25, %v3126_v7  ;;  %v816_v34 = vrot.slane %v219_v25, %v3145_v18 }
  0x35   : > { %v830_v37 = vrot.slane %v219_v25, %v3153_v23 }
  0x36   : > { %685 = vbcast.lane.b32.xlu1 %v683_v29, 256  ;;  %678 = vbcast.lane.b32.xlu0 %v676_v30, 256  ;;  %v164_v29 = vadd.f32 1.0, %v148_v26  ;;  %v809_v30 = vrot.slane %v219_v25, %v3132_v10 }
  0x3a   : > { %699 = vbcast.lane.b32.xlu1 %v697_v32, 256  ;;  %692 = vbcast.lane.b32.xlu0 %v690_v33, 256  ;;  %v180_v32 = vmul.f32 31.5, %v164_v29  ;;  %v823_v33 = vrot.slane %v219_v25, %v3140_v15 }
  0x3e   : > { %713 = vbcast.lane.b32.xlu1 %v711_v35, 256  ;;  %706 = vbcast.lane.b32.xlu0 %v704_v36, 256  ;;  %v196_v35 = vmax.f32 %v180_v32, 0.0  ;;  %v837_v36 = vrot.slane %v219_v25, %v3148_v20 }
  0x42   : > { %727 = vbcast.lane.b32.xlu1 %v725_v38, 256  ;;  %720 = vbcast.lane.b32.xlu0 %v718_v39, 256  ;;  %v212_v38 = vmin.f32 %v196_v35, 63.0  ;;  %v156_v39 = vld [vmem:[%s3118_s25 + $0x58] sm:$0xff] }
  0x44   : > { %v403_v40 = vrot.slane %v212_v38, %v3135_v11  ;;  %v396_v41 = vrot.slane %v212_v38, %v3129_v8  ;;  %v410_v44 = vrot.slane %v212_v38, %v3126_v7  ;;  %v424_v47 = vrot.slane %v212_v38, %v3145_v18 }
  0x45   : > { %v438_v50 = vrot.slane %v212_v38, %v3153_v23 }
  0x46   : > { %293 = vbcast.lane.b32.xlu1 %v291_v42, 256  ;;  %286 = vbcast.lane.b32.xlu0 %v284_v43, 256  ;;  %v172_v42 = vadd.f32 1.0, %v156_v39  ;;  %v417_v43 = vrot.slane %v212_v38, %v3132_v10 }
  0x4a   : > { %307 = vbcast.lane.b32.xlu1 %v305_v45, 256  ;;  %300 = vbcast.lane.b32.xlu0 %v298_v46, 256  ;;  %v188_v45 = vmul.f32 31.5, %v172_v42  ;;  %v431_v46 = vrot.slane %v212_v38, %v3140_v15 }
  0x4e   : > { %321 = vbcast.lane.b32.xlu1 %v319_v48, 256  ;;  %314 = vbcast.lane.b32.xlu0 %v312_v49, 256  ;;  %v204_v48 = vmax.f32 %v188_v45, 0.0  ;;  %v445_v49 = vrot.slane %v212_v38, %v3148_v20 }
  0x52   : > { %335 = vbcast.lane.b32.xlu1 %v333_v51, 256  ;;  %328 = vbcast.lane.b32.xlu0 %v326_v52, 256  ;;  %v220_v51 = vmin.f32 %v204_v48, 63.0  ;;  %v149_v52 = vld [vmem:[%s3118_s25 + $0x20] sm:$0xff] }
  0x54   : > { %v851_v53 = vrot.slane %v220_v51, %v3135_v11  ;;  %v844_v54 = vrot.slane %v220_v51, %v3129_v8  ;;  %v858_v57 = vrot.slane %v220_v51, %v3126_v7  ;;  %v879_v63 = vrot.slane %v220_v51, %v3140_v15 }
  0x55   : > { %v886_v12 = vrot.slane %v220_v51, %v3153_v23 }
  0x56   : > { %741 = vbcast.lane.b32.xlu1 %v739_v55, 256  ;;  %734 = vbcast.lane.b32.xlu0 %v732_v56, 256  ;;  %v165_v55 = vadd.f32 1.0, %v149_v52  ;;  %v865_v56 = vrot.slane %v220_v51, %v3132_v10 }
  0x5a   : > { %755 = vbcast.lane.b32.xlu1 %v753_v58, 256  ;;  %748 = vbcast.lane.b32.xlu0 %v746_v59, 256  ;;  %v181_v58 = vmul.f32 31.5, %v165_v55 }
  0x5e   : > { %769 = vbcast.lane.b32.xlu1 %v767_v61, 256  ;;  %762 = vbcast.lane.b32.xlu0 %v760_v62, 256  ;;  %v3045_v61 = vmov 1983009808  }
  0x5f   : > { %v1123_v62 = vunpack.c.l.s4 %v3045_v61  ;;  %v150_v61 = vld [vmem:[%s3118_s25 + $0x28] sm:$0xff] }
  0x62   : > { %783 = vbcast.lane.b32.xlu1 %v781_v1, 256  ;;  %776 = vbcast.lane.b32.xlu0 %v774_v2, 256  ;;  %v872_v1 = vrot.slane %v220_v51, %v3145_v18  ;;  %v197_v2 = vmax.f32 %v181_v58, 0.0 }
  0x66   : > { %349 = vbcast.lane.b32.xlu1 %v347_v6, 256  ;;  %342 = vbcast.lane.b32.xlu0 %v340_v9, 256  ;;  %v1124_v6 = vunpack.c.0.s8 %v1123_v62  ;;  %v893_v9 = vrot.slane %v220_v51, %v3148_v20 }
  0x6a   : > { %363 = vbcast.lane.b32.xlu1 %v361_v13, 256  ;;  %356 = vbcast.lane.b32.xlu0 %v354_v14, 256  ;;  %v213_v13 = vmin.f32 %v197_v2, 63.0  ;;  %v157_v14 = vld [vmem:[%s3118_s25 + $0x60] sm:$0xff] }
  0x6c   : > { %v459_v26 = vrot.slane %v213_v13, %v3135_v11  ;;  %v487_v48 = vrot.slane %v213_v13, %v3140_v15 }
  0x6e   : > { %377 = vbcast.lane.b32.xlu1 %v375_v17, 256  ;;  %370 = vbcast.lane.b32.xlu0 %v368_v19, 256  ;;  %v1156_v17 = vunpack.c.l.s4 %v3046_v16 }
  0x70   : > { %v1157_v29 = vunpack.c.0.s8 %v1156_v17 }
  0x72   : > { %391 = vbcast.lane.b32.xlu1 %v389_v22, 256  ;;  %384 = vbcast.lane.b32.xlu0 %v382_v24, 256  ;;  %v3222_v24 = vsub.s32 %v1124_v6, %v3122_v3  ;;  %v166_v6 = vadd.f32 1.0, %v150_v61 }
  0x76   : > { %797 = vbcast.lane.b32.xlu1 %v795_v27, 256  ;;  %790 = vbcast.lane.b32.xlu0 %v788_v28, 256  ;;  %v452_v27 = vrot.slane %v213_v13, %v3129_v8  ;;  %v173_v28 = vadd.f32 1.0, %v157_v14 }
  0x78   : > { %v189_v38 = vmul.f32 31.5, %v173_v28 }
  0x7a   : > { %811 = vbcast.lane.b32.xlu1 %v809_v30, 256  ;;  %804 = vbcast.lane.b32.xlu0 %v802_v31, 256 }
  0x7e   : > { %825 = vbcast.lane.b32.xlu1 %v823_v33, 256  ;;  %818 = vbcast.lane.b32.xlu0 %v816_v34, 256 }
  0x82   : > { %839 = vbcast.lane.b32.xlu1 %v837_v36, 256  ;;  %832 = vbcast.lane.b32.xlu0 %v830_v37, 256  ;;  %v473_v36 = vrot.slane %v213_v13, %v3132_v10  ;;  %v466_v37 = vrot.slane %v213_v13, %v3126_v7 }
  0x86   : > { %405 = vbcast.lane.b32.xlu1 %v403_v40, 256  ;;  %398 = vbcast.lane.b32.xlu0 %v396_v41, 256  ;;  %v3233_v41 = vsub.s32 %v1157_v29, %v3122_v3 }
  0x8a   : > { %419 = vbcast.lane.b32.xlu1 %v417_v43, 256  ;;  %412 = vbcast.lane.b32.xlu0 %v410_v44, 256 }
  0x8e   : > { %433 = vbcast.lane.b32.xlu1 %v431_v46, 256  ;;  %426 = vbcast.lane.b32.xlu0 %v424_v47, 256 }
  0x92   : > { %447 = vbcast.lane.b32.xlu1 %v445_v49, 256  ;;  %440 = vbcast.lane.b32.xlu0 %v438_v50, 256  ;;  %v480_v49 = vrot.slane %v213_v13, %v3145_v18  ;;  %v205_v50 = vmax.f32 %v189_v38, 0.0 }
  0x94   : > { %v221_v58 = vmin.f32 %v205_v50, 63.0 }
  0x96   : > { %853 = vbcast.lane.b32.xlu1 %v851_v53, 256  ;;  %846 = vbcast.lane.b32.xlu0 %v844_v54, 256 }
  0x98   : > { %v245_v59 = vpop.permute.xlu1 %244  ;;  %v231_v60 = vpop.permute.xlu0 %230 }
  0x99   : > { %v1121_v25 = vcombine.low %v231_v60, %v245_v59 }
  0x9a   : > { %867 = vbcast.lane.b32.xlu1 %v865_v56, 256  ;;  %860 = vbcast.lane.b32.xlu0 %v858_v57, 256  ;;  %v501_v56 = vrot.slane %v213_v13, %v3148_v20  ;;  %v494_v57 = vrot.slane %v213_v13, %v3153_v23 }
  0x9b   : > { %v1128_v35 = vrot.slane %v1121_v25, %v3222_v24 }
  0x9c   : > { %v252_v4 = vpop.permute.xlu1 %251  ;;  %v238_v5 = vpop.permute.xlu0 %237 }
  0x9d   : > { %v1129_v19 = vcombine.low %v238_v5, %v252_v4  ;;  %v907_v4 = vrot.slane %v221_v58, %v3135_v11  ;;  %v900_v5 = vrot.slane %v221_v58, %v3129_v8 }
  0x9e   : > { %881 = vbcast.lane.b32.xlu1 %v879_v63, 256  ;;  %874 = vbcast.lane.b32.xlu0 %v872_v1, 256 }
  0x9f   : > { %v1136_v30 = vrot.slane %v1129_v19, %v3222_v24  ;;  %v921_v19 = vrot.slane %v221_v58, %v3132_v10 }
  0xa0   : > { %v266_v21 = vpop.permute.xlu1 %265  ;;  %v259_v22 = vpop.permute.xlu0 %258 }
  0xa1   : > { %v1153_v42 = vcombine.low %v1128_v35, %v1136_v30  ;;  %v1154_v43 = vcombine.high %v1128_v35, %v1136_v30 }
  0xa2   : > { %895 = vbcast.lane.b32.xlu1 %v893_v9, 256  ;;  %888 = vbcast.lane.b32.xlu0 %v886_v12, 256 }
  0xa3   : > { %v3244_v52 = vrot.slane %v1153_v42, %v3233_v41  ;;  %v3247_v53 = vrot.slane %v1154_v43, %v3233_v41  ;;  %v949_v43 = vrot.slane %v221_v58, %v3148_v20 }
  0xa4   : > { %v280_v31 = vpop.permute.xlu1 %279  ;;  %v273_v32 = vpop.permute.xlu0 %272 }
  0xa5   : > { %v1145_v33 = vcombine.low %v266_v21, %v280_v31  ;;  %v1137_v34 = vcombine.low %v259_v22, %v273_v32  ;;  %v914_v21 = vrot.slane %v221_v58, %v3126_v7  ;;  %v182_v22 = vmul.f32 31.5, %v166_v6 }
  0xa6   : > { %461 = vbcast.lane.b32.xlu1 %v459_v26, 256  ;;  %454 = vbcast.lane.b32.xlu0 %v452_v27, 256 }
  0xa7   : > { %v1152_v39 = vrot.slane %v1145_v33, %v3222_v24  ;;  %v1144_v40 = vrot.slane %v1137_v34, %v3222_v24  ;;  %v935_v33 = vrot.slane %v221_v58, %v3140_v15  ;;  %v928_v34 = vrot.slane %v221_v58, %v3145_v18 }
  0xa8   : > { %v686_v44 = vpop.permute.xlu1 %685  ;;  %v679_v45 = vpop.permute.xlu0 %678  ;;  %v198_v35 = vmax.f32 %v182_v22, 0.0 }
  0xa9   : > { %v1169_v46 = vcombine.low %v1144_v40, %v1152_v39  ;;  %v1170_v47 = vcombine.high %v1144_v40, %v1152_v39 }
  0xaa   : > { %475 = vbcast.lane.b32.xlu1 %v473_v36, 256  ;;  %468 = vbcast.lane.b32.xlu0 %v466_v37, 256 }
  0xab   : > { %v3238_v51 = vrot.slane %v1169_v46, %v3233_v41  ;;  %v3241_v3 = vrot.slane %v1170_v47, %v3233_v41 }
  0xac   : > { %v700_v54 = vpop.permute.xlu1 %699  ;;  %v693_v55 = vpop.permute.xlu0 %692 }
  0xad   : > { %v1673_v62 = vcombine.low %v686_v44, %v700_v54  ;;  %v1665_v63 = vcombine.low %v679_v45, %v693_v55  ;;  %v942_v44 = vrot.slane %v221_v58, %v3153_v23  ;;  %v214_v45 = vmin.f32 %v198_v35, 63.0 }
  0xae   : > { %489 = vbcast.lane.b32.xlu1 %v487_v48, 256  ;;  %482 = vbcast.lane.b32.xlu0 %v480_v49, 256  ;;  %v158_v48 = vld [vmem:[%s3118_s25 + $0x68] sm:$0xff] }
  0xaf   : > { %v1680_v9 = vrot.slane %v1673_v62, %v3222_v24  ;;  %v1672_v12 = vrot.slane %v1665_v63, %v3222_v24  ;;  %v174_v61 = vadd.f32 1.0, %v158_v48  ;;  %v522_v6 = vrot.slane %v214_v45, %v3126_v7 }
  0xb0   : > { %v714_v1 = vpop.permute.xlu1 %713  ;;  %v707_v2 = vpop.permute.xlu0 %706  ;;  %v550_v35 = vrot.slane %v214_v45, %v3153_v23 }
  0xb1   : > { %v1697_v27 = vcombine.low %v1672_v12, %v1680_v9  ;;  %v1698_v28 = vcombine.high %v1672_v12, %v1680_v9  ;;  %v190_v9 = vmul.f32 31.5, %v174_v61 }
  0xb2   : > { %503 = vbcast.lane.b32.xlu1 %v501_v56, 256  ;;  %496 = vbcast.lane.b32.xlu0 %v494_v57, 256  ;;  %v515_v56 = vrot.slane %v214_v45, %v3135_v11  ;;  %v508_v57 = vrot.slane %v214_v45, %v3129_v8 }
  0xb3   : > { %v3273_v38 = vrot.slane %v1697_v27, %v3233_v41  ;;  %v3276_v39 = vrot.slane %v1698_v28, %v3233_v41  ;;  %v206_v27 = vmax.f32 %v190_v9, 0.0 }
  0xb4   : > { %v728_v13 = vpop.permute.xlu1 %727  ;;  %v721_v14 = vpop.permute.xlu0 %720 }
  0xb5   : > { %v1689_v16 = vcombine.low %v714_v1, %v728_v13  ;;  %v1681_v17 = vcombine.low %v707_v2, %v721_v14 }
  0xb6   : > { %909 = vbcast.lane.b32.xlu1 %v907_v4, 256  ;;  %902 = vbcast.lane.b32.xlu0 %v900_v5, 256  ;;  %v529_v5 = vrot.slane %v214_v45, %v3132_v10 }
  0xb7   : > { %v1696_v25 = vrot.slane %v1689_v16, %v3222_v24  ;;  %v1688_v26 = vrot.slane %v1681_v17, %v3222_v24 }
  0xb8   : > { %v294_v29 = vpop.permute.xlu1 %293  ;;  %v287_v30 = vpop.permute.xlu0 %286 }
  0xb9   : > { %v1713_v31 = vcombine.low %v1688_v26, %v1696_v25  ;;  %v1714_v32 = vcombine.high %v1688_v26, %v1696_v25  ;;  %v543_v25 = vrot.slane %v214_v45, %v3140_v15  ;;  %v536_v26 = vrot.slane %v214_v45, %v3145_v18 }
  0xba   : > { %923 = vbcast.lane.b32.xlu1 %v921_v19, 256  ;;  %916 = vbcast.lane.b32.xlu0 %v914_v21, 256 }
  0xbb   : > { %v3267_v36 = vrot.slane %v1713_v31, %v3233_v41  ;;  %v3270_v37 = vrot.slane %v1714_v32, %v3233_v41 }
  0xbc   : > { %v308_v40 = vpop.permute.xlu1 %307  ;;  %v301_v42 = vpop.permute.xlu0 %300 }
  0xbd   : > { %v1197_v49 = vcombine.low %v294_v29, %v308_v40  ;;  %v1189_v50 = vcombine.low %v287_v30, %v301_v42  ;;  %v222_v40 = vmin.f32 %v206_v27, 63.0 }
  0xbe   : > { %937 = vbcast.lane.b32.xlu1 %v935_v33, 256  ;;  %930 = vbcast.lane.b32.xlu0 %v928_v34, 256  ;;  %v557_v34 = vrot.slane %v214_v45, %v3148_v20 }
  0xbf   : > { %v1204_v58 = vrot.slane %v1197_v49, %v3222_v24  ;;  %v1196_v62 = vrot.slane %v1189_v50, %v3222_v24 }
  0xc0   : > { %v322_v54 = vpop.permute.xlu1 %321  ;;  %v315_v55 = vpop.permute.xlu0 %314 }
  0xc1   : > { %v1221_v14 = vcombine.low %v1196_v62, %v1204_v58  ;;  %v1222_v16 = vcombine.high %v1196_v62, %v1204_v58 }
  0xc2   : > { %951 = vbcast.lane.b32.xlu1 %v949_v43, 256  ;;  %944 = vbcast.lane.b32.xlu0 %v942_v44, 256  ;;  %v151_v44 = vld [vmem:[%s3118_s25 + $0x30] sm:$0xff] }
  0xc3   : > { %v3302_v30 = vrot.slane %v1221_v14, %v3233_v41  ;;  %v3305_v31 = vrot.slane %v1222_v16, %v3233_v41  ;;  %v2549_v43 = vld [vmem:[%s4068_s1 + $0xb0] sm:$0xff] }
  0xc4   : > { %v336_v63 = vpop.permute.xlu1 %335  ;;  %v329_v1 = vpop.permute.xlu0 %328 }
  0xc5   : > { %v1213_v2 = vcombine.low %v322_v54, %v336_v63  ;;  %v1205_v4 = vcombine.low %v315_v55, %v329_v1  ;;  %v963_v55 = vrot.slane %v222_v40, %v3135_v11 }
  0xc6   : > { %517 = vbcast.lane.b32.xlu1 %v515_v56, 256  ;;  %510 = vbcast.lane.b32.xlu0 %v508_v57, 256  ;;  %v956_v56 = vrot.slane %v222_v40, %v3129_v8  ;;  %v167_v57 = vadd.f32 1.0, %v151_v44  ;;  %v1005_v44 = vrot.slane %v222_v40, %v3148_v20 }
  0xc7   : > { %v1220_v12 = vrot.slane %v1213_v2, %v3222_v24  ;;  %v1212_v13 = vrot.slane %v1205_v4, %v3222_v24  ;;  %v977_v2 = vrot.slane %v222_v40, %v3132_v10  ;;  %v970_v4 = vrot.slane %v222_v40, %v3126_v7 }
  0xc8   : > { %v742_v17 = vpop.permute.xlu1 %741  ;;  %v735_v19 = vpop.permute.xlu0 %734 }
  0xc9   : > { %v1237_v21 = vcombine.low %v1212_v13, %v1220_v12  ;;  %v1238_v22 = vcombine.high %v1212_v13, %v1220_v12 }
  0xca   : > { %531 = vbcast.lane.b32.xlu1 %v529_v5, 256  ;;  %524 = vbcast.lane.b32.xlu0 %v522_v6, 256  ;;  %v183_v5 = vmul.f32 31.5, %v167_v57 }
  0xcb   : > { %v3296_v28 = vrot.slane %v1237_v21, %v3233_v41  ;;  %v3299_v29 = vrot.slane %v1238_v22, %v3233_v41  ;;  %v991_v21 = vrot.slane %v222_v40, %v3140_v15  ;;  %v984_v22 = vrot.slane %v222_v40, %v3145_v18 }
  0xcc   : > { %v756_v32 = vpop.permute.xlu1 %755  ;;  %v749_v33 = vpop.permute.xlu0 %748 }
  0xcd   : > { %v1741_v48 = vcombine.low %v742_v17, %v756_v32  ;;  %v1733_v49 = vcombine.low %v735_v19, %v749_v33 }
  0xce   : > { %545 = vbcast.lane.b32.xlu1 %v543_v25, 256  ;;  %538 = vbcast.lane.b32.xlu0 %v536_v26, 256  ;;  %v199_v25 = vmax.f32 %v183_v5, 0.0 }
  0xcf   : > { %v1748_v45 = vrot.slane %v1741_v48, %v3222_v24  ;;  %v1740_v61 = vrot.slane %v1733_v49, %v3222_v24  ;;  %v998_v48 = vrot.slane %v222_v40, %v3153_v23 }
  0xd0   : > { %v770_v50 = vpop.permute.xlu1 %769  ;;  %v763_v54 = vpop.permute.xlu0 %762  ;;  %v215_v49 = vmin.f32 %v199_v25, 63.0 }
  0xd1   : > { %v1765_v12 = vcombine.low %v1740_v61, %v1748_v45  ;;  %v1766_v13 = vcombine.high %v1740_v61, %v1748_v45 }
  0xd2   : > { %559 = vbcast.lane.b32.xlu1 %v557_v34, 256  ;;  %552 = vbcast.lane.b32.xlu0 %v550_v35, 256 }
  0xd3   : > { %v3331_v32 = vrot.slane %v1765_v12, %v3233_v41  ;;  %v3334_v33 = vrot.slane %v1766_v13, %v3233_v41  ;;  %v578_v12 = vrot.slane %v215_v49, %v3126_v7 }
  0xd4   : > { %v784_v58 = vpop.permute.xlu1 %783  ;;  %v777_v62 = vpop.permute.xlu0 %776 }
  0xd5   : > { %v1757_v63 = vcombine.low %v770_v50, %v784_v58  ;;  %v1749_v1 = vcombine.low %v763_v54, %v777_v62  ;;  %v571_v58 = vrot.slane %v215_v49, %v3135_v11  ;;  %v564_v62 = vrot.slane %v215_v49, %v3129_v8 }
  0xd6   : > { %965 = vbcast.lane.b32.xlu1 %v963_v55, 256  ;;  %958 = vbcast.lane.b32.xlu0 %v956_v56, 256  ;;  %v159_v55 = vld [vmem:[%s3118_s25 + $0x70] sm:$0xff] }
  0xd7   : > { %v1764_v6 = vrot.slane %v1757_v63, %v3222_v24  ;;  %v1756_v9 = vrot.slane %v1749_v1, %v3222_v24  ;;  %v175_v63 = vadd.f32 1.0, %v159_v55 }
  0xd8   : > { %v350_v14 = vpop.permute.xlu1 %349  ;;  %v343_v16 = vpop.permute.xlu0 %342 }
  0xd9   : > { %v1781_v17 = vcombine.low %v1756_v9, %v1764_v6  ;;  %v1782_v19 = vcombine.high %v1756_v9, %v1764_v6  ;;  %v585_v9 = vrot.slane %v215_v49, %v3132_v10  ;;  %v191_v13 = vmul.f32 31.5, %v175_v63 }
  0xda   : > { %979 = vbcast.lane.b32.xlu1 %v977_v2, 256  ;;  %972 = vbcast.lane.b32.xlu0 %v970_v4, 256  ;;  %v606_v63 = vrot.slane %v215_v49, %v3153_v23 }
  0xdb   : > { %v3325_v26 = vrot.slane %v1781_v17, %v3233_v41  ;;  %v3328_v27 = vrot.slane %v1782_v19, %v3233_v41 }
  0xdc   : > { %v364_v34 = vpop.permute.xlu1 %363  ;;  %v357_v35 = vpop.permute.xlu0 %356 }
  0xdd   : > { %v1265_v56 = vcombine.low %v350_v14, %v364_v34  ;;  %v1257_v57 = vcombine.low %v343_v16, %v357_v35  ;;  %v599_v35 = vrot.slane %v215_v49, %v3140_v15 }
  0xde   : > { %993 = vbcast.lane.b32.xlu1 %v991_v21, 256  ;;  %986 = vbcast.lane.b32.xlu0 %v984_v22, 256 }
  0xdf   : > { %v1272_v40 = vrot.slane %v1265_v56, %v3222_v24  ;;  %v1264_v1 = vrot.slane %v1257_v57, %v3222_v24 }
  0xe0   : > { %v378_v45 = vpop.permute.xlu1 %377  ;;  %v371_v61 = vpop.permute.xlu0 %370 }
  0xe1   : > { %v1289_v17 = vcombine.low %v1264_v1, %v1272_v40  ;;  %v1290_v19 = vcombine.high %v1264_v1, %v1272_v40 }
  0xe2   : > { %1007 = vbcast.lane.b32.xlu1 %v1005_v44, 256  ;;  %1000 = vbcast.lane.b32.xlu0 %v998_v48, 256  ;;  %v592_v44 = vrot.slane %v215_v49, %v3145_v18  ;;  %v207_v48 = vmax.f32 %v191_v13, 0.0 }
  0xe3   : > { %v3360_v57 = vrot.slane %v1289_v17, %v3233_v41 }
  0xe4   : > { %v392_v2 = vpop.permute.xlu1 %391  ;;  %v385_v4 = vpop.permute.xlu0 %384  ;;  %v223_v40 = vmin.f32 %v207_v48, 63.0 }
  0xe5   : > { %v1281_v5 = vcombine.low %v378_v45, %v392_v2  ;;  %v1273_v6 = vcombine.low %v371_v61, %v385_v4  ;;  %v3363_v45 = vrot.slane %v1290_v19, %v3233_v41  ;;  %v152_v4 = vld [vmem:[%s3118_s25 + $0x38] sm:$0xff] }
  0xe6   : > { %573 = vbcast.lane.b32.xlu1 %v571_v58, 256  ;;  %566 = vbcast.lane.b32.xlu0 %v564_v62, 256  ;;  %v613_v62 = vrot.slane %v215_v49, %v3148_v20  ;;  %v1019_v13 = vrot.slane %v223_v40, %v3135_v11 }
  0xe7   : > { %v1288_v14 = vrot.slane %v1281_v5, %v3222_v24  ;;  %v1280_v16 = vrot.slane %v1273_v6, %v3222_v24 }
  0xe8   : > { %v798_v21 = vpop.permute.xlu1 %797  ;;  %v791_v22 = vpop.permute.xlu0 %790 }
  0xe9   : > { %v1305_v25 = vcombine.low %v1280_v16, %v1288_v14  ;;  %v1306_v34 = vcombine.high %v1280_v16, %v1288_v14  ;;  %v1012_v14 = vrot.slane %v223_v40, %v3129_v8  ;;  %v168_v16 = vadd.f32 1.0, %v152_v4 }
  0xea   : > { %587 = vbcast.lane.b32.xlu1 %v585_v9, 256  ;;  %580 = vbcast.lane.b32.xlu0 %v578_v12, 256 }
  0xeb   : > { %v3354_v55 = vrot.slane %v1305_v25, %v3233_v41  ;;  %v3357_v56 = vrot.slane %v1306_v34, %v3233_v41 }
  0xec   : > { %v812_v61 = vpop.permute.xlu1 %811  ;;  %v805_v58 = vpop.permute.xlu0 %804 }
  0xed   : > { %v1809_v5 = vcombine.low %v798_v21, %v812_v61  ;;  %v1801_v6 = vcombine.low %v791_v22, %v805_v58  ;;  %v1033_v21 = vrot.slane %v223_v40, %v3132_v10  ;;  %v1026_v22 = vrot.slane %v223_v40, %v3126_v7 }
  0xee   : > { %601 = vbcast.lane.b32.xlu1 %v599_v35, 256  ;;  %594 = vbcast.lane.b32.xlu0 %v592_v44, 256  ;;  %v184_v44 = vmul.f32 31.5, %v168_v16 }
  0xef   : > { %v1816_v49 = vrot.slane %v1809_v5, %v3222_v24  ;;  %v1808_v17 = vrot.slane %v1801_v6, %v3222_v24 }
  0xf0   : > { %v826_v9 = vpop.permute.xlu1 %825  ;;  %v819_v12 = vpop.permute.xlu0 %818 }
  0xf1   : > { %v1833_v58 = vcombine.low %v1808_v17, %v1816_v49 }
  0xf2   : > { %615 = vbcast.lane.b32.xlu1 %v613_v62, 256  ;;  %608 = vbcast.lane.b32.xlu0 %v606_v63, 256  ;;  %v1834_v62 = vcombine.high %v1808_v17, %v1816_v49 }
  0xf3   : > { %v3389_v49 = vrot.slane %v1833_v58, %v3233_v41 }
  0xf4   : > { %v840_v19 = vpop.permute.xlu1 %839  ;;  %v833_v25 = vpop.permute.xlu0 %832  ;;  %v3392_v17 = vrot.slane %v1834_v62, %v3233_v41 }
  0xf5   : > { %v1825_v34 = vcombine.low %v826_v9, %v840_v19  ;;  %v1817_v35 = vcombine.low %v819_v12, %v833_v25  ;;  %v1047_v9 = vrot.slane %v223_v40, %v3140_v15  ;;  %v1040_v12 = vrot.slane %v223_v40, %v3145_v18 }
  0xf6   : > { %1021 = vbcast.lane.b32.xlu1 %v1019_v13, 256  ;;  %1014 = vbcast.lane.b32.xlu0 %v1012_v14, 256  ;;  %v200_v13 = vmax.f32 %v184_v44, 0.0 }
  0xf7   : > { %v1832_v48 = vrot.slane %v1825_v34, %v3222_v24  ;;  %v1824_v61 = vrot.slane %v1817_v35, %v3222_v24  ;;  %v1061_v34 = vrot.slane %v223_v40, %v3148_v20  ;;  %v1054_v35 = vrot.slane %v223_v40, %v3153_v23 }
  0xf8   : > { %v406_v63 = vpop.permute.xlu1 %405  ;;  %v399_v4 = vpop.permute.xlu0 %398 }
  0xf9   : > { %v1849_v5 = vcombine.low %v1824_v61, %v1832_v48  ;;  %v1850_v6 = vcombine.high %v1824_v61, %v1832_v48  ;;  %v160_v48 = vld [vmem:[%s3118_s25 + $0x78] sm:$0xff]  ;;  %s2985_s25 = sshll.u32 %s3048_s13, 4  ;;  %s2986_s25 = int_to_ptr.vmem [resolvable:$false] %s2985_s25 }
  0xfa   : > { %1035 = vbcast.lane.b32.xlu1 %v1033_v21, 256  ;;  %1028 = vbcast.lane.b32.xlu0 %v1026_v22, 256  ;;  %v3396_v21 = vmin.f32 %v200_v13, 63.0  ;;  %s2987_s26 = scalar_lea.vmem %s2986_s25, 4096  ;;  %p2988_p0 = scmp.lt.s32.totalorder %s4021_s16, %s2986_s25 }
  0xfb   : > { %v3383_v14 = vrot.slane %v1849_v5, %v3233_v41  ;;  %v3386_v16 = vrot.slane %v1850_v6, %v3233_v41  ;;  %p2989_p1 = scmp.lt.s32.totalorder %s2987_s26, %s2981_s24 }
  0xfc   : > { %v420_v19 = vpop.permute.xlu1 %419  ;;  %v413_v25 = vpop.permute.xlu0 %412  ;;  %v627_v6 = vrot.slane %v3396_v21, %v3135_v11  ;;  %v620_v40 = vrot.slane %v3396_v21, %v3129_v8 }
  0xfd   : > { %v1333_v61 = vcombine.low %v406_v63, %v420_v19  ;;  %v1325_v58 = vcombine.low %v399_v4, %v413_v25  ;;  %v2544_v63 = vld [vmem:[%s4068_s1 + $0x88] sm:$0xff]  ;;  %p2990_p2 = por %p2989_p1, %p2988_p0 }
  0xfe   : > { %1049 = vbcast.lane.b32.xlu1 %v1047_v9, 256  ;;  %1042 = vbcast.lane.b32.xlu0 %v1040_v12, 256  ;;  %v176_v9 = vadd.f32 1.0, %v160_v48  ;;  %v2543_v12 = vld [vmem:[%s4068_s1 + $0x80] sm:$0xff]  ;;  %v2528_v48 = vld [vmem:[%s4068_s1 + $0x8] sm:$0xff] }
  0xff   : > { %v1340_v4 = vrot.slane %v1333_v61, %v3222_v24  ;;  %v1332_v13 = vrot.slane %v1325_v58, %v3222_v24  ;;  %v641_v61 = vrot.slane %v3396_v21, %v3132_v10  ;;  %v634_v58 = vrot.slane %v3396_v21, %v3126_v7  ;;  %p2991_p3 = pnand %p2990_p2, %p2984_p13 }
 0x100   : > { %v434_v62 = vpop.permute.xlu1 %433  ;;  %v427_v5 = vpop.permute.xlu0 %426 }
 0x102   : > { %1063 = vbcast.lane.b32.xlu1 %v1061_v34, 256  ;;  %1056 = vbcast.lane.b32.xlu0 %v1054_v35, 256  ;;  %v2889_v34 = vpack.c.bf16 %v2544_v63, %v2543_v12  ;;  %v2527_v35 = vld [vmem:[%s4068_s1] sm:$0xff]  ;;  %v192_v12 = vmul.f32 31.5, %v176_v9 }
 0x103   : > { %v2891_v1 = vpack.c.bf16 %v2528_v48, %v2527_v35 }
 0x104   : > { %v448_v19 = vpop.permute.xlu1 %447  ;;  %v441_v25 = vpop.permute.xlu0 %440  ;;  %2890 = vmatprep.subr.bf16.mxu0 %v2889_v34  ;;  %2921 = vmatprep.subr.bf16.mxu1 %v2889_v34 }
 0x105   : > { %v1349_v2 = vcombine.low %v434_v62, %v448_v19  ;;  %v1341_v44 = vcombine.low %v427_v5, %v441_v25  ;;  %v2545_v62 = vld [vmem:[%s4068_s1 + $0x90] sm:$0xff]  ;;  %v2546_v5 = vld [vmem:[%s4068_s1 + $0x98] sm:$0xff]  ;;  %2892 = vmatpush3.bf16.msra.mxu0 %v2891_v1  ;;  %2929 = vmatpush3.bf16.msra.mxu1 %v2891_v1  ;;  %v648_v1 = vrot.slane %v3396_v21, %v3145_v18 }
 0x106   : > { %629 = vbcast.lane.b32.xlu1 %v627_v6, 256  ;;  %622 = vbcast.lane.b32.xlu0 %v620_v40, 256  ;;  %v1357_v6 = vcombine.low %v1332_v13, %v1340_v4  ;;  %v1358_v40 = vcombine.high %v1332_v13, %v1340_v4  ;;  %v2893_v9 = vpack.c.bf16 %v2546_v5, %v2545_v62  ;;  %v208_v13 = vmax.f32 %v192_v12, 0.0 }
 0x107   : > { %v1356_v63 = vrot.slane %v1349_v2, %v3222_v24  ;;  %v1348_v22 = vrot.slane %v1341_v44, %v3222_v24  ;;  %v2529_v2 = vld [vmem:[%s4068_s1 + $0x10] sm:$0xff]  ;;  %v2530_v44 = vld [vmem:[%s4068_s1 + $0x18] sm:$0xff]  ;;  %v655_v4 = vrot.slane %v3396_v21, %v3140_v15 }
 0x108   : > { %v854_v19 = vpop.permute.xlu1 %853  ;;  %v847_v25 = vpop.permute.xlu0 %846  ;;  %v2895_v48 = vpack.c.bf16 %v2530_v44, %v2529_v2  ;;  %2894 = vmatprep.subr.bf16.mxu0 %v2893_v9  ;;  %2922 = vmatprep.subr.bf16.mxu1 %v2893_v9  ;;  %v3459_v12 = vrot.slane %v1358_v40, %v3233_v41  ;;  %v2531_v9 = vld [vmem:[%s4068_s1 + $0x20] sm:$0xff]  ;;  %v662_v40 = vrot.slane %v3396_v21, %v3153_v23 }
 0x109   : > { %v1373_v34 = vcombine.low %v1348_v22, %v1356_v63  ;;  %v1374_v35 = vcombine.high %v1348_v22, %v1356_v63  ;;  %v2547_v22 = vld [vmem:[%s4068_s1 + $0xa0] sm:$0xff] }
 0x10a   : > { %643 = vbcast.lane.b32.xlu1 %v641_v61, 256  ;;  %636 = vbcast.lane.b32.xlu0 %v634_v58, 256  ;;  %v2548_v61 = vld [vmem:[%s4068_s1 + $0xa8] sm:$0xff]  ;;  %v3456_v58 = vrot.slane %v1357_v6, %v3233_v41  ;;  %v669_v6 = vrot.slane %v3396_v21, %v3148_v20  ;;  %v2550_v21 = vld [vmem:[%s4068_s1 + $0xb8] sm:$0xff] }
 0x10b   : > { %v3444_v62 = vrot.slane %v1373_v34, %v3233_v41  ;;  %v3447_v5 = vrot.slane %v1374_v35, %v3233_v41  ;;  %2896 = vmatpush3.bf16.msra.mxu0 %v2895_v48  ;;  %2930 = vmatpush3.bf16.msra.mxu1 %v2895_v48  ;;  %v2897_v44 = vpack.c.bf16 %v2548_v61, %v2547_v22  ;;  %v2532_v34 = vld [vmem:[%s4068_s1 + $0x28] sm:$0xff]  ;;  %v3471_v35 = vmin.f32 %v208_v13, 63.0  ;;  %v2533_v61 = vld [vmem:[%s4068_s1 + $0x30] sm:$0xff] }
 0x10c   : > { %v868_v63 = vpop.permute.xlu1 %867  ;;  %v861_v2 = vpop.permute.xlu0 %860  ;;  %v2899_v48 = vpack.c.bf16 %v2532_v34, %v2531_v9  ;;  %v2901_v34 = vpack.c.bf16 %v2550_v21, %v2549_v43  ;;  %v2551_v43 = vld [vmem:[%s4068_s1 + $0xc0] sm:$0xff] }
 0x10d   : > { %2898 = vmatprep.subr.bf16.mxu0 %v2897_v44  ;;  %2923 = vmatprep.subr.bf16.mxu1 %v2897_v44  ;;  %v2534_v44 = vld [vmem:[%s4068_s1 + $0x38] sm:$0xff] }
 0x10e   : > { %657 = vbcast.lane.b32.xlu1 %v655_v4, 256  ;;  %650 = vbcast.lane.b32.xlu0 %v648_v1, 256  ;;  %v1877_v4 = vcombine.low %v854_v19, %v868_v63  ;;  %v1869_v1 = vcombine.low %v847_v25, %v861_v2  ;;  %v2903_v22 = vpack.c.bf16 %v2534_v44, %v2533_v61  ;;  %v2552_v63 = vld [vmem:[%s4068_s1 + $0xc8] sm:$0xff] }
 0x10f   : > { %2900 = vmatpush3.bf16.msra.mxu0 %v2899_v48  ;;  %2931 = vmatpush3.bf16.msra.mxu1 %v2899_v48  ;;  %v1075_v19 = vrot.slane %v3471_v35, %v3135_v11  ;;  %v1068_v25 = vrot.slane %v3471_v35, %v3129_v8  ;;  %v2905_v11 = vpack.c.bf16 %v2552_v63, %v2551_v43  ;;  %v2535_v8 = vld [vmem:[%s4068_s1 + $0x40] sm:$0xff]  ;;  %v2536_v61 = vld [vmem:[%s4068_s1 + $0x48] sm:$0xff] }
 0x110   : > { %v882_v13 = vpop.permute.xlu1 %881  ;;  %v875_v9 = vpop.permute.xlu0 %874  ;;  %2902 = vmatprep.subr.bf16.mxu0 %v2901_v34  ;;  %2924 = vmatprep.subr.bf16.mxu1 %v2901_v34  ;;  %v1884_v2 = vrot.slane %v1877_v4, %v3222_v24  ;;  %v2907_v44 = vpack.c.bf16 %v2536_v61, %v2535_v8  ;;  %v1089_v4 = vrot.slane %v3471_v35, %v3132_v10  ;;  %v2554_v10 = vld [vmem:[%s4068_s1 + $0xd8] sm:$0xff] }
 0x111   : > { %v1096_v8 = vrot.slane %v3471_v35, %v3145_v18  ;;  %v2556_v18 = vld [vmem:[%s4068_s1 + $0xe8] sm:$0xff] }
 0x112   : > { %671 = vbcast.lane.b32.xlu1 %v669_v6, 256  ;;  %664 = vbcast.lane.b32.xlu0 %v662_v40, 256  ;;  %v1876_v6 = vrot.slane %v1869_v1, %v3222_v24 }
 0x113   : > { %2904 = vmatpush3.bf16.msra.mxu0 %v2903_v22  ;;  %2932 = vmatpush3.bf16.msra.mxu1 %v2903_v22  ;;  %v1082_v22 = vrot.slane %v3471_v35, %v3126_v7 }
 0x114   : > { %v896_v40 = vpop.permute.xlu1 %895  ;;  %v889_v48 = vpop.permute.xlu0 %888  ;;  %2906 = vmatprep.subr.bf16.mxu0 %v2905_v11  ;;  %2925 = vmatprep.subr.bf16.mxu1 %v2905_v11  ;;  %v1902_v63 = vcombine.high %v1876_v6, %v1884_v2  ;;  %v1901_v7 = vcombine.low %v1876_v6, %v1884_v2  ;;  %v1103_v11 = vrot.slane %v3471_v35, %v3140_v15  ;;  %v2555_v15 = vld [vmem:[%s4068_s1 + $0xe0] sm:$0xff] }
 0x115   : > { %v1893_v21 = vcombine.low %v882_v13, %v896_v40  ;;  %v1885_v34 = vcombine.low %v875_v9, %v889_v48  ;;  %v2553_v13 = vld [vmem:[%s4068_s1 + $0xd0] sm:$0xff]  ;;  %v2538_v48 = vld [vmem:[%s4068_s1 + $0x58] sm:$0xff] }
 0x116   : > { %1077 = vbcast.lane.b32.xlu1 %v1075_v19, 256  ;;  %1070 = vbcast.lane.b32.xlu0 %v1068_v25, 256  ;;  %v2909_v25 = vpack.c.bf16 %v2554_v10, %v2553_v13  ;;  %v2537_v40 = vld [vmem:[%s4068_s1 + $0x50] sm:$0xff]  ;;  %v2913_v13 = vpack.c.bf16 %v2556_v18, %v2555_v15  ;;  %v1732_v15 = vcombine.high %v3276_v39, %v3270_v37 }
 0x117   : > { %v1900_v1 = vrot.slane %v1893_v21, %v3222_v24  ;;  %v1892_v43 = vrot.slane %v1885_v34, %v3222_v24  ;;  %2908 = vmatpush3.bf16.msra.mxu0 %v2907_v44  ;;  %2933 = vmatpush3.bf16.msra.mxu1 %v2907_v44  ;;  %v2911_v2 = vpack.c.bf16 %v2538_v48, %v2537_v40  ;;  %v2558_v40 = vld [vmem:[%s4068_s1 + $0xf8] sm:$0xff] }
 0x118   : > { %v462_v54 = vpop.permute.xlu1 %461  ;;  %v455_v42 = vpop.permute.xlu0 %454  ;;  %2910 = vmatprep.subr.bf16.mxu0 %v2909_v25  ;;  %2926 = vmatprep.subr.bf16.mxu1 %v2909_v25  ;;  %v3536_v21 = vrot.slane %v1902_v63, %v3233_v41  ;;  %v2540_v63 = vld [vmem:[%s4068_s1 + $0x68] sm:$0xff]  ;;  %v2557_v25 = vld [vmem:[%s4068_s1 + $0xf0] sm:$0xff]  ;;  %v1188_v18 = vcombine.high %v3247_v53, %v3241_v3 }
 0x119   : > { %v1917_v9 = vcombine.low %v1892_v43, %v1900_v1  ;;  %v1918_v19 = vcombine.high %v1892_v43, %v1900_v1  ;;  %v1110_v1 = vrot.slane %v3471_v35, %v3153_v23  ;;  %v2539_v43 = vld [vmem:[%s4068_s1 + $0x60] sm:$0xff]  ;;  %v2917_v48 = vpack.c.bf16 %v2558_v40, %v2557_v25 }
 0x11a   : > { %1091 = vbcast.lane.b32.xlu1 %v1089_v4, 256  ;;  %1084 = vbcast.lane.b32.xlu0 %v1082_v22, 256  ;;  %v3545_v4 = vrot.slane %v1901_v7, %v3233_v41  ;;  %v1117_v22 = vrot.slane %v3471_v35, %v3148_v20  ;;  %v2915_v10 = vpack.c.bf16 %v2540_v63, %v2539_v43 }
 0x11b   : > { %v3530_v6 = vrot.slane %v1917_v9, %v3233_v41  ;;  %v3533_v61 = vrot.slane %v1918_v19, %v3233_v41  ;;  %2912 = vmatpush3.bf16.msra.mxu0 %v2911_v2  ;;  %2934 = vmatpush3.bf16.msra.mxu1 %v2911_v2  ;;  %v1730_v25 = vcombine.high %v3273_v38, %v3267_v36 }
 0x11c   : > { %v476_v34 = vpop.permute.xlu1 %475  ;;  %v469_v44 = vpop.permute.xlu0 %468  ;;  %2914 = vmatprep.subr.bf16.mxu0 %v2913_v13  ;;  %2927 = vmatprep.subr.bf16.mxu1 %v2913_v13 }
 0x11d   : > { %v1401_v9 = vcombine.low %v462_v54, %v476_v34  ;;  %v1393_v23 = vcombine.low %v455_v42, %v469_v44  ;;  %v2541_v54 = vld [vmem:[%s4068_s1 + $0x70] sm:$0xff]  ;;  %v2542_v42 = vld [vmem:[%s4068_s1 + $0x78] sm:$0xff] }
 0x11e   : > { %1105 = vbcast.lane.b32.xlu1 %v1103_v11, 256  ;;  %1098 = vbcast.lane.b32.xlu0 %v1096_v8, 256  ;;  %v2919_v11 = vpack.c.bf16 %v2542_v42, %v2541_v54 }
 0x11f   : > { %2916 = vmatpush3.bf16.msra.mxu0 %v2915_v10  ;;  %2935 = vmatpush3.bf16.msra.mxu1 %v2915_v10  ;;  %v1408_v8 = vrot.slane %v1401_v9, %v3222_v24  ;;  %v1400_v2 = vrot.slane %v1393_v23, %v3222_v24 }
 0x120   : > { %v490_v35 = vpop.permute.xlu1 %489  ;;  %v483_v19 = vpop.permute.xlu0 %482  ;;  %2918 = vmatprep.subr.bf16.mxu0 %v2917_v48  ;;  %2928 = vmatprep.subr.bf16.mxu1 %v2917_v48 }
 0x121   : > { %v1425_v13 = vcombine.low %v1400_v2, %v1408_v8  ;;  %v1426_v10 = vcombine.high %v1400_v2, %v1408_v8 }
 0x122   : > { %1119 = vbcast.lane.b32.xlu1 %v1117_v22, 256  ;;  %1112 = vbcast.lane.b32.xlu0 %v1110_v1, 256 }
 0x123   : > { %2920 = vmatpush3.bf16.msra.mxu0 %v2919_v11  ;;  %2936 = vmatpush3.bf16.msra.mxu1 %v2919_v11  ;;  %v3596_v42 = vrot.slane %v1425_v13, %v3233_v41  ;;  %v3599_v11 = vrot.slane %v1426_v10, %v3233_v41  ;;  %v1798_v13 = vcombine.high %v3331_v32, %v3325_v26 }
 0x124   : > { %v504_v34 = vpop.permute.xlu1 %503  ;;  %v497_v44 = vpop.permute.xlu0 %496  ;;  %v1254_v10 = vcombine.high %v3302_v30, %v3296_v28 }
 0x125   : > { %v1417_v43 = vcombine.low %v490_v35, %v504_v34  ;;  %v1409_v63 = vcombine.low %v483_v19, %v497_v44  ;;  %v1186_v35 = vcombine.high %v3244_v52, %v3238_v51  ;;  %v1800_v34 = vcombine.high %v3334_v33, %v3328_v27 }
 0x126   : > { %2305 = vrot.lane.b32.xlu1 %v1732_v15, %s3047_s5  ;;  %2289 = vrot.lane.b32.xlu0 %v1188_v18, %s3047_s5  ;;  %v1256_v44 = vcombine.high %v3305_v31, %v3299_v29  ;;  %v1322_v18 = vcombine.high %v3360_v57, %v3354_v55  ;;  %v1866_v15 = vcombine.high %v3389_v49, %v3383_v14 }
 0x127   : > { %v1424_v22 = vrot.slane %v1417_v43, %v3222_v24  ;;  %v1416_v1 = vrot.slane %v1409_v63, %v3222_v24 }
 0x128   : > { %v910_v9 = vpop.permute.xlu1 %909  ;;  %v903_v23 = vpop.permute.xlu0 %902 }
 0x129   : > { %v1441_v19 = vcombine.low %v1416_v1, %v1424_v22  ;;  %v1442_v40 = vcombine.high %v1416_v1, %v1424_v22 }
 0x12a   : > { %2241 = vrot.lane.b32.xlu1 %v1730_v25, %s3047_s5  ;;  %2225 = vrot.lane.b32.xlu0 %v1186_v35, %s3047_s5 }
 0x12b   : > { %v3590_v48 = vrot.slane %v1441_v19, %v3233_v41  ;;  %v3593_v54 = vrot.slane %v1442_v40, %v3233_v41 }
 0x12c   : > { %v924_v8 = vpop.permute.xlu1 %923  ;;  %v917_v2 = vpop.permute.xlu0 %916 }
 0x12d   : > { %v1945_v43 = vcombine.low %v910_v9, %v924_v8  ;;  %v1937_v63 = vcombine.low %v903_v23, %v917_v2  ;;  %v1324_v9 = vcombine.high %v3363_v45, %v3357_v56  ;;  %v1868_v23 = vcombine.high %v3392_v17, %v3386_v16 }
 0x12e   : > { %2307 = vrot.lane.b32.xlu1 %v1800_v34, %s3047_s5  ;;  %2291 = vrot.lane.b32.xlu0 %v1256_v44, %s3047_s5  ;;  %v1458_v50 = vcombine.high %v3596_v42, %v3590_v48 }
 0x12f   : > { %v1952_v25 = vrot.slane %v1945_v43, %v3222_v24  ;;  %v1944_v35 = vrot.slane %v1937_v63, %v3222_v24 }
 0x130   : > { %v938_v22 = vpop.permute.xlu1 %937  ;;  %v931_v1 = vpop.permute.xlu0 %930 }
 0x131   : > { %v1969_v43 = vcombine.low %v1944_v35, %v1952_v25  ;;  %v1970_v63 = vcombine.high %v1944_v35, %v1952_v25 }
 0x132   : > { %2243 = vrot.lane.b32.xlu1 %v1798_v13, %s3047_s5  ;;  %2227 = vrot.lane.b32.xlu0 %v1254_v10, %s3047_s5 }
 0x133   : > { %v3640_v25 = vrot.slane %v1969_v43, %v3233_v41  ;;  %v3643_v35 = vrot.slane %v1970_v63, %v3233_v41 }
 0x134   : > { %v952_v19 = vpop.permute.xlu1 %951  ;;  %v945_v40 = vpop.permute.xlu0 %944 }
 0x135   : > { %v1961_v8 = vcombine.low %v938_v22, %v952_v19  ;;  %v1953_v2 = vcombine.low %v931_v1, %v945_v40 }
 0x136   : > { %2293 = vrot.lane.b32.xlu0 %v1324_v9, %s3047_s5  ;;  %2309 = vrot.lane.b32.xlu1 %v1868_v23, %s3047_s5 }
 0x137   : > { %v1968_v34 = vrot.slane %v1961_v8, %v3222_v24  ;;  %v1960_v44 = vrot.slane %v1953_v2, %v3222_v24  ;;  %v1392_v8 = vcombine.high %v3459_v12, %v3447_v5 }
 0x138   : > { %v518_v13 = vpop.permute.xlu1 %517  ;;  %v511_v10 = vpop.permute.xlu0 %510 }
 0x139   : > { %v1985_v22 = vcombine.low %v1960_v44, %v1968_v34  ;;  %v1986_v1 = vcombine.high %v1960_v44, %v1968_v34 }
 0x13a   : > { %2229 = vrot.lane.b32.xlu0 %v1322_v18, %s3047_s5  ;;  %2245 = vrot.lane.b32.xlu1 %v1866_v15, %s3047_s5  ;;  %v1936_v15 = vcombine.high %v3536_v21, %v3533_v61 }
 0x13b   : > { %v3634_v19 = vrot.slane %v1985_v22, %v3233_v41  ;;  %v3637_v40 = vrot.slane %v1986_v1, %v3233_v41  ;;  %v1390_v22 = vcombine.high %v3456_v58, %v3444_v62  ;;  %v1934_v1 = vcombine.high %v3545_v4, %v3530_v6 }
 0x13c   : > { %v532_v9 = vpop.permute.xlu1 %531  ;;  %v525_v23 = vpop.permute.xlu0 %524 }
 0x13d   : > { %v1469_v34 = vcombine.low %v518_v13, %v532_v9  ;;  %v1461_v44 = vcombine.low %v511_v10, %v525_v23  ;;  %v1460_v13 = vcombine.high %v3599_v11, %v3593_v54  ;;  %v2004_v10 = vcombine.high %v3643_v35, %v3637_v40 }
 0x13e   : > { %2295 = vrot.lane.b32.xlu0 %v1392_v8, %s3047_s5  ;;  %2311 = vrot.lane.b32.xlu1 %v1936_v15, %s3047_s5  ;;  %v2002_v60 = vcombine.high %v3640_v25, %v3634_v19 }
 0x13f   : > { %v1476_v8 = vrot.slane %v1469_v34, %v3222_v24  ;;  %v1468_v15 = vrot.slane %v1461_v44, %v3222_v24 }
 0x140   : > { %v546_v43 = vpop.permute.xlu1 %545  ;;  %v539_v63 = vpop.permute.xlu0 %538 }
 0x141   : > { %v1493_v44 = vcombine.low %v1468_v15, %v1476_v8 }
 0x142   : > { %2231 = vrot.lane.b32.xlu0 %v1390_v22, %s3047_s5  ;;  %2247 = vrot.lane.b32.xlu1 %v1934_v1, %s3047_s5  ;;  %v1494_v22 = vcombine.high %v1468_v15, %v1476_v8 }
 0x143   : > { %v3687_v15 = vrot.slane %v1493_v44, %v3233_v41 }
 0x144   : > { %v560_v18 = vpop.permute.xlu1 %559  ;;  %v553_v2 = vpop.permute.xlu0 %552 }
 0x145   : > { %v1485_v9 = vcombine.low %v546_v43, %v560_v18  ;;  %v1477_v23 = vcombine.low %v539_v63, %v553_v2  ;;  %v3678_v43 = vrot.slane %v1494_v22, %v3233_v41  ;;  %4094 = vst [vmem:[#allocation7_spill] sm:$0xff] %v3687_v15 }
 0x146   : > { %2297 = vrot.lane.b32.xlu0 %v1460_v13, %s3047_s5  ;;  %2313 = vrot.lane.b32.xlu1 %v2004_v10, %s3047_s5 }
 0x147   : > { %v1492_v1 = vrot.slane %v1485_v9, %v3222_v24  ;;  %v1484_v34 = vrot.slane %v1477_v23, %v3222_v24 }
 0x148   : > { %v966_v20 = vpop.permute.xlu1 %965  ;;  %v959_v7 = vpop.permute.xlu0 %958 }
 0x149   : > { %v1509_v18 = vcombine.low %v1484_v34, %v1492_v1  ;;  %v1510_v2 = vcombine.high %v1484_v34, %v1492_v1 }
 0x14a   : > { %2233 = vrot.lane.b32.xlu0 %v1458_v50, %s3047_s5  ;;  %2249 = vrot.lane.b32.xlu1 %v2002_v60, %s3047_s5 }
 0x14b   : > { %v3681_v63 = vrot.slane %v1509_v18, %v3233_v41  ;;  %v3684_v8 = vrot.slane %v1510_v2, %v3233_v41 }
 0x14c   : > { %v980_v13 = vpop.permute.xlu1 %979  ;;  %v973_v10 = vpop.permute.xlu0 %972 }
 0x14d   : > { %4092 = vst [vmem:[#allocation5_spill] sm:$0xff] %v3681_v63  ;;  %4093 = vst [vmem:[#allocation6_spill] sm:$0xff] %v3684_v8  ;;  %v1528_v9 = vcombine.high %v3678_v43, %v3684_v8  ;;  %v2013_v23 = vcombine.low %v966_v20, %v980_v13  ;;  %v2005_v22 = vcombine.low %v959_v7, %v973_v10 }
 0x14e   : > { %v1526_v44 = vcombine.high %v3687_v15, %v3681_v63 }
 0x14f   : > { %2299 = vrot.lane.b32.xlu0 %v1528_v9, %s3047_s5  ;;  %v2020_v18 = vrot.slane %v2013_v23, %v3222_v24  ;;  %v2012_v2 = vrot.slane %v2005_v22, %v3222_v24 }
 0x150   : > { %v994_v1 = vpop.permute.xlu1 %993  ;;  %v987_v34 = vpop.permute.xlu0 %986 }
 0x151   : > { %v2038_v50 = vcombine.high %v2012_v2, %v2020_v18  ;;  %v2037_v13 = vcombine.low %v2012_v2, %v2020_v18 }
 0x153   : > { %2235 = vrot.lane.b32.xlu0 %v1526_v44, %s3047_s5  ;;  %v3704_v23 = vrot.slane %v2038_v50, %v3233_v41 }
 0x154   : > { %v1008_v47 = vpop.permute.xlu1 %1007  ;;  %v1001_v60 = vpop.permute.xlu0 %1000 }
 0x155   : > { %v2029_v59 = vcombine.low %v994_v1, %v1008_v47  ;;  %v2021_v46 = vcombine.low %v987_v34, %v1001_v60  ;;  %4095 = vst [vmem:[#allocation8_spill] sm:$0xff] %v3704_v23  ;;  %v3713_v47 = vrot.slane %v2037_v13, %v3233_v41 }
 0x157   : > { %v2036_v7 = vrot.slane %v2029_v59, %v3222_v24  ;;  %v2028_v20 = vrot.slane %v2021_v46, %v3222_v24  ;;  %4098 = vst [vmem:[#allocation11_spill] sm:$0xff] %v3713_v47 }
 0x158   : > { %v574_v10 = vpop.permute.xlu1 %573  ;;  %v567_v9 = vpop.permute.xlu0 %566 }
 0x159   : > { %v2053_v0 = vcombine.low %v2028_v20, %v2036_v7  ;;  %v2054_v63 = vcombine.high %v2028_v20, %v2036_v7 }
 0x15b   : > { %v3707_v22 = vrot.slane %v2053_v0, %v3233_v41  ;;  %v3710_v44 = vrot.slane %v2054_v63, %v3233_v41 }
 0x15c   : > { %v588_v59 = vpop.permute.xlu1 %587  ;;  %v581_v60 = vpop.permute.xlu0 %580 }
 0x15d   : > { %4096 = vst [vmem:[#allocation9_spill] sm:$0xff] %v3707_v22  ;;  %4097 = vst [vmem:[#allocation10_spill] sm:$0xff] %v3710_v44  ;;  %v2072_v46 = vcombine.high %v3704_v23, %v3710_v44  ;;  %v1537_v34 = vcombine.low %v574_v10, %v588_v59  ;;  %v1529_v0 = vcombine.low %v567_v9, %v581_v60 }
 0x15e   : > { %v2070_v2 = vcombine.high %v3713_v47, %v3707_v22 }
 0x15f   : > { %2315 = vrot.lane.b32.xlu1 %v2072_v46, %s3047_s5  ;;  %v1544_v7 = vrot.slane %v1537_v34, %v3222_v24  ;;  %v1536_v20 = vrot.slane %v1529_v0, %v3222_v24 }
 0x160   : > { %v602_v63 = vpop.permute.xlu1 %601  ;;  %v595_v18 = vpop.permute.xlu0 %594 }
 0x161   : > { %v1562_v50 = vcombine.high %v1536_v20, %v1544_v7  ;;  %v1561_v59 = vcombine.low %v1536_v20, %v1544_v7 }
 0x163   : > { %2251 = vrot.lane.b32.xlu1 %v2070_v2, %s3047_s5  ;;  %v3730_v34 = vrot.slane %v1562_v50, %v3233_v41 }
 0x164   : > { %v616_v13 = vpop.permute.xlu1 %615  ;;  %v609_v1 = vpop.permute.xlu0 %608 }
 0x165   : > { %v1553_v44 = vcombine.low %v602_v63, %v616_v13  ;;  %v1545_v23 = vcombine.low %v595_v18, %v609_v1  ;;  %4099 = vst [vmem:[#allocation12_spill] sm:$0xff] %v3730_v34  ;;  %v3739_v1 = vrot.slane %v1561_v59, %v3233_v41 }
 0x167   : > { %v1560_v10 = vrot.slane %v1553_v44, %v3222_v24  ;;  %v1552_v9 = vrot.slane %v1545_v23, %v3222_v24  ;;  %4102 = vst [vmem:[#allocation15_spill] sm:$0xff] %v3739_v1 }
 0x168   : > { %v1022_v60 = vpop.permute.xlu1 %1021  ;;  %v1015_v46 = vpop.permute.xlu0 %1014 }
 0x169   : > { %v1577_v15 = vcombine.low %v1552_v9, %v1560_v10  ;;  %v1578_v22 = vcombine.high %v1552_v9, %v1560_v10 }
 0x16b   : > { %v3733_v0 = vrot.slane %v1577_v15, %v3233_v41  ;;  %v3736_v2 = vrot.slane %v1578_v22, %v3233_v41 }
 0x16c   : > { %v1036_v44 = vpop.permute.xlu1 %1035  ;;  %v1029_v63 = vpop.permute.xlu0 %1028 }
 0x16d   : > { %4100 = vst [vmem:[#allocation13_spill] sm:$0xff] %v3733_v0  ;;  %4101 = vst [vmem:[#allocation14_spill] sm:$0xff] %v3736_v2  ;;  %v1596_v23 = vcombine.high %v3730_v34, %v3736_v2  ;;  %v2081_v7 = vcombine.low %v1022_v60, %v1036_v44  ;;  %v2073_v15 = vcombine.low %v1015_v46, %v1029_v63 }
 0x16e   : > { %v1594_v13 = vcombine.high %v3739_v1, %v3733_v0 }
 0x16f   : > { %2301 = vrot.lane.b32.xlu0 %v1596_v23, %s3047_s5  ;;  %v2088_v10 = vrot.slane %v2081_v7, %v3222_v24  ;;  %v2080_v9 = vrot.slane %v2073_v15, %v3222_v24 }
 0x170   : > { %v1050_v22 = vpop.permute.xlu1 %1049  ;;  %v1043_v20 = vpop.permute.xlu0 %1042 }
 0x171   : > { %v2106_v50 = vcombine.high %v2080_v9, %v2088_v10  ;;  %v2105_v44 = vcombine.low %v2080_v9, %v2088_v10 }
 0x173   : > { %2237 = vrot.lane.b32.xlu0 %v1594_v13, %s3047_s5  ;;  %v3756_v7 = vrot.slane %v2106_v50, %v3233_v41 }
 0x174   : > { %v1064_v59 = vpop.permute.xlu1 %1063  ;;  %v1057_v18 = vpop.permute.xlu0 %1056 }
 0x175   : > { %v2097_v2 = vcombine.low %v1050_v22, %v1064_v59  ;;  %v2089_v34 = vcombine.low %v1043_v20, %v1057_v18  ;;  %4103 = vst [vmem:[#allocation16_spill] sm:$0xff] %v3756_v7  ;;  %v3765_v18 = vrot.slane %v2105_v44, %v3233_v41 }
 0x177   : > { %v2104_v60 = vrot.slane %v2097_v2, %v3222_v24  ;;  %v2096_v46 = vrot.slane %v2089_v34, %v3222_v24  ;;  %4106 = vst [vmem:[#allocation19_spill] sm:$0xff] %v3765_v18 }
 0x178   : > { %v630_v63 = vpop.permute.xlu1 %629  ;;  %v623_v23 = vpop.permute.xlu0 %622 }
 0x179   : > { %v2121_v47 = vcombine.low %v2096_v46, %v2104_v60  ;;  %v2122_v0 = vcombine.high %v2096_v46, %v2104_v60 }
 0x17b   : > { %v3759_v15 = vrot.slane %v2121_v47, %v3233_v41  ;;  %v3762_v13 = vrot.slane %v2122_v0, %v3233_v41 }
 0x17c   : > { %v644_v2 = vpop.permute.xlu1 %643  ;;  %v637_v22 = vpop.permute.xlu0 %636 }
 0x17d   : > { %4104 = vst [vmem:[#allocation17_spill] sm:$0xff] %v3759_v15  ;;  %4105 = vst [vmem:[#allocation18_spill] sm:$0xff] %v3762_v13  ;;  %v2140_v34 = vcombine.high %v3756_v7, %v3762_v13  ;;  %v1605_v10 = vcombine.low %v630_v63, %v644_v2  ;;  %v1597_v47 = vcombine.low %v623_v23, %v637_v22 }
 0x17e   : > { %v2138_v59 = vcombine.high %v3765_v18, %v3759_v15  ;;  %v4107_v18 = vlaneseq }
 0x17f   : > { %2317 = vrot.lane.b32.xlu1 %v2140_v34, %s3047_s5  ;;  %v1612_v60 = vrot.slane %v1605_v10, %v3222_v24  ;;  %v1604_v46 = vrot.slane %v1597_v47, %v3222_v24 }
 0x180   : > { %v658_v0 = vpop.permute.xlu1 %657  ;;  %v651_v9 = vpop.permute.xlu0 %650  ;;  %v2371_v10 = vand.u32 127, %v4107_v18 }
 0x181   : > { %v1630_v50 = vcombine.high %v1604_v46, %v1612_v60  ;;  %v1629_v2 = vcombine.low %v1604_v46, %v1612_v60 }
 0x182   : > { %v2372_v60 = vadd.s32 128, %v2371_v10 }
 0x183   : > { %2253 = vrot.lane.b32.xlu1 %v2138_v59, %s3047_s5  ;;  %v3783_v47 = vrot.slane %v1630_v50, %v3233_v41 }
 0x184   : > { %v672_v44 = vpop.permute.xlu1 %671  ;;  %v665_v20 = vpop.permute.xlu0 %664 }
 0x185   : > { %v1621_v13 = vcombine.low %v658_v0, %v672_v44  ;;  %v1613_v7 = vcombine.low %v651_v9, %v665_v20  ;;  %4108 = vst [vmem:[#allocation20_spill] sm:$0xff] %v3783_v47 }
 0x187   : > { %v1628_v63 = vrot.slane %v1621_v13, %v3222_v24  ;;  %v1620_v23 = vrot.slane %v1613_v7, %v3222_v24  ;;  %v3792_v13 = vrot.slane %v1629_v2, %v3233_v41 }
 0x188   : > { %v1078_v22 = vpop.permute.xlu1 %1077  ;;  %v1071_v34 = vpop.permute.xlu0 %1070 }
 0x189   : > { %v1645_v1 = vcombine.low %v1620_v23, %v1628_v63  ;;  %v1646_v15 = vcombine.high %v1620_v23, %v1628_v63  ;;  %4111 = vst [vmem:[#allocation23_spill] sm:$0xff] %v3792_v13  ;;  %v2384_v23 = vand.u32 63, %v2372_v60 }
 0x18b   : > { %v3786_v59 = vrot.slane %v1645_v1, %v3233_v41  ;;  %v3789_v20 = vrot.slane %v1646_v15, %v3233_v41 }
 0x18c   : > { %v1092_v7 = vpop.permute.xlu1 %1091  ;;  %v1085_v0 = vpop.permute.xlu0 %1084 }
 0x18d   : > { %4109 = vst [vmem:[#allocation21_spill] sm:$0xff] %v3786_v59  ;;  %4110 = vst [vmem:[#allocation22_spill] sm:$0xff] %v3789_v20  ;;  %v1664_v9 = vcombine.high %v3783_v47, %v3789_v20  ;;  %v2149_v1 = vcombine.low %v1078_v22, %v1092_v7  ;;  %v2141_v46 = vcombine.low %v1071_v34, %v1085_v0  ;;  %v2377_v22 = vand.u32 63, %v2371_v10 }
 0x18e   : > { %v1662_v63 = vcombine.high %v3792_v13, %v3786_v59  ;;  %v3806_v34 = vcvt.s32.f32 %v2384_v23  ;;  %v4113_v10 = vcombine.low %v3247_v53, %v3241_v3  ;;  %v4114_v23 = vcombine.low %v3273_v38, %v3267_v36 }
 0x18f   : > { %2303 = vrot.lane.b32.xlu0 %v1664_v9, %s3047_s5  ;;  %v2156_v2 = vrot.slane %v2149_v1, %v3222_v24  ;;  %v2148_v8 = vrot.slane %v2141_v46, %v3222_v24 }
 0x190   : > { %v1106_v15 = vpop.permute.xlu1 %1105  ;;  %v1099_v44 = vpop.permute.xlu0 %1098 }
 0x191   : > { %v2174_v7 = vcombine.high %v2148_v8, %v2156_v2  ;;  %v2173_v60 = vcombine.low %v2148_v8, %v2156_v2 }
 0x193   : > { %2239 = vrot.lane.b32.xlu0 %v1662_v63, %s3047_s5  ;;  %v4112_v63 = vcombine.low %v3276_v39, %v3270_v37  ;;  %v3823_v8 = vrot.slane %v2174_v7, %v3233_v41 }
 0x194   : > { %v1120_v18 = vpop.permute.xlu1 %1119  ;;  %v1113_v20 = vpop.permute.xlu0 %1112 }
 0x195   : > { %v2165_v47 = vcombine.low %v1106_v15, %v1120_v18  ;;  %v2157_v50 = vcombine.low %v1099_v44, %v1113_v20  ;;  %v3818_v15 = vcvt.s32.f32 %v2377_v22  ;;  %v3832_v44 = vrot.slane %v2173_v60, %v3233_v41 }
 0x196   : > { %v4115_v22 = vcombine.low %v3244_v52, %v3238_v51 }
 0x197   : > { %v2172_v0 = vrot.slane %v2165_v47, %v3222_v24  ;;  %v2164_v9 = vrot.slane %v2157_v50, %v3222_v24 }
 0x198   : > { %v2306_v59 = vpop.permute.xlu1 %2305  ;;  %v2290_v1 = vpop.permute.xlu0 %2289 }
 0x199   : > { %v2189_v13 = vcombine.low %v2164_v9, %v2172_v0  ;;  %v2190_v46 = vcombine.high %v2164_v9, %v2172_v0  ;;  %v2362_v18 = vsel %vm2337_vm0, %v4112_v63, %v2306_v59  ;;  %v2354_v20 = vsel %vm2337_vm0, %v4113_v10, %v2290_v1 }
 0x19a   : > { %v2400_v47 = vsub.f32 %v2354_v20, %v3806_v34  ;;  %v2416_v24 = vsub.f32 %v2362_v18, %v3806_v34  ;;  %v4116_v10 = vcombine.low %v3334_v33, %v3328_v27 }
 0x19b   : > { %v3826_v50 = vrot.slane %v2189_v13, %v3233_v41  ;;  %v3829_v37 = vrot.slane %v2190_v46, %v3233_v41 }
 0x19c   : > { %v2242_v39 = vpop.permute.xlu1 %2241  ;;  %v2226_v59 = vpop.permute.xlu0 %2225  ;;  %v2432_v3 = vand.u32 2147483647, %v2400_v47  ;;  %v2448_v53 = vand.u32 2147483647, %v2416_v24  ;;  %v4117_v47 = vcombine.low %v3305_v31, %v3299_v29 }
 0x19d   : > { %v2346_v2 = vsel %vm2337_vm0, %v4114_v23, %v2242_v39  ;;  %v2338_v13 = vsel %vm2337_vm0, %v4115_v22, %v2226_v59  ;;  %v2208_v7 = vcombine.high %v3823_v8, %v3829_v37  ;;  %v2207_v36 = vcombine.low %v3823_v8, %v3829_v37 }
 0x19e   : > { %v2415_v0 = vsub.f32 %v2346_v2, %v3818_v15  ;;  %v2399_v9 = vsub.f32 %v2338_v13, %v3818_v15  ;;  %v2464_v1 = vsub.f32 1.0, %v2432_v3  ;;  %v2480_v41 = vsub.f32 1.0, %v2448_v53 }
 0x19f   : > { %2319 = vrot.lane.b32.xlu1 %v2208_v7, %s3047_s5  ;;  %v2205_v38 = vcombine.low %v3832_v44, %v3826_v50  ;;  %v2206_v39 = vcombine.high %v3832_v44, %v3826_v50  ;;  %v4118_v13 = vcombine.low %v3331_v32, %v3325_v26 }
 0x1a0   : > { %v2447_v51 = vand.u32 2147483647, %v2415_v0  ;;  %v2431_v52 = vand.u32 2147483647, %v2399_v9  ;;  %v2308_v60 = vpop.permute.xlu1 %2307  ;;  %v2292_v46 = vpop.permute.xlu0 %2291  ;;  %v2496_v63 = vmax.f32 %v2464_v1, 0.0  ;;  %v2512_v18 = vmax.f32 %v2480_v41, 0.0 }
 0x1a1   : > { %v2363_v20 = vsel %vm2337_vm0, %v4116_v10, %v2308_v60  ;;  %v2355_v24 = vsel %vm2337_vm0, %v4117_v47, %v2292_v46  ;;  %v4119_v0 = vcombine.low %v3302_v30, %v3296_v28  ;;  %v4120_v10 = vcombine.low %v3392_v17, %v3386_v16 }
 0x1a2   : > { %v2479_v59 = vsub.f32 1.0, %v2447_v51  ;;  %v2463_v3 = vsub.f32 1.0, %v2431_v52  ;;  %v2418_v53 = vsub.f32 %v2363_v20, %v3806_v34  ;;  %v2402_v23 = vsub.f32 %v2355_v24, %v3806_v34  ;;  %2623 = vmatprep.mubr.f32.mxu0 %v2496_v63  ;;  %2663 = vmatprep.mubr.f32.mxu1 %v2512_v18 }
 0x1a3   : > { %2255 = vrot.lane.b32.xlu1 %v2206_v39, %s3047_s5  ;;  %v4121_v30 = vcombine.low %v3363_v45, %v3357_v56  ;;  %v4123_v45 = vcombine.low %v3360_v57, %v3354_v55  ;;  %v4125_v57 = vcombine.low %v3459_v12, %v3447_v5  ;;  %v4127_v12 = vcombine.low %v3456_v58, %v3444_v62 }
 0x1a4   : > { %v2450_v27 = vand.u32 2147483647, %v2418_v53  ;;  %v2434_v33 = vand.u32 2147483647, %v2402_v23  ;;  %v2244_v2 = vpop.permute.xlu1 %2243  ;;  %v2228_v22 = vpop.permute.xlu0 %2227  ;;  %v2495_v29 = vmax.f32 %v2463_v3, 0.0  ;;  %v2511_v31 = vmax.f32 %v2479_v59, 0.0 }
 0x1a5   : > { %v2347_v7 = vsel %vm2337_vm0, %v4118_v13, %v2244_v2  ;;  %v2339_v9 = vsel %vm2337_vm0, %v4119_v0, %v2228_v22  ;;  %v4129_v58 = vcombine.low %v3599_v11, %v3593_v54  ;;  %v4131_v11 = vcombine.low %v3596_v42, %v3590_v48 }
 0x1a6   : > { %v2482_v1 = vsub.f32 1.0, %v2450_v27  ;;  %v2466_v41 = vsub.f32 1.0, %v2434_v33  ;;  %v2417_v51 = vsub.f32 %v2347_v7, %v3818_v15  ;;  %v2401_v52 = vsub.f32 %v2339_v9, %v3818_v15  ;;  %2624 = vmatmul.mubr.f32.vlgmr.msra.gmra.mrb[0].mxu0 %v2495_v29  ;;  %2664 = vmatmul.mubr.f32.vlgmr.msra.gmra.mrb[0].mxu1 %v2511_v31 }
 0x1a7   : > { %v4122_v33 = vcombine.low %v3389_v49, %v3383_v14 }
 0x1a8   : > { %v2449_v60 = vand.u32 2147483647, %v2417_v51  ;;  %v2433_v46 = vand.u32 2147483647, %v2401_v52  ;;  %v2310_v63 = vpop.permute.xlu1 %2309  ;;  %v2294_v18 = vpop.permute.xlu0 %2293  ;;  %v2498_v26 = vmax.f32 %v2466_v41, 0.0  ;;  %v2514_v32 = vmax.f32 %v2482_v1, 0.0 }
 0x1a9   : > { %v2364_v28 = vsel %vm2337_vm0, %v4120_v10, %v2310_v63  ;;  %v2356_v20 = vsel %vm2337_vm0, %v4121_v30, %v2294_v18  ;;  %v4124_v41 = vcombine.low %v3536_v21, %v3533_v61 }
 0x1aa   : > { %v2481_v47 = vsub.f32 1.0, %v2449_v60  ;;  %v2465_v24 = vsub.f32 1.0, %v2433_v46  ;;  %v2420_v39 = vsub.f32 %v2364_v28, %v3806_v34  ;;  %v2404_v59 = vsub.f32 %v2356_v20, %v3806_v34  ;;  %2628 = vmatprep.mubr.f32.mxu0 %v2498_v26  ;;  %2668 = vmatprep.mubr.f32.mxu1 %v2514_v32 }
 0x1ab   : > { %v4126_v28 = vcombine.low %v3545_v4, %v3530_v6 }
 0x1ac   : > { %v2452_v3 = vand.u32 2147483647, %v2420_v39  ;;  %v2436_v53 = vand.u32 2147483647, %v2404_v59  ;;  %v2246_v23 = vpop.permute.xlu1 %2245  ;;  %v2230_v27 = vpop.permute.xlu0 %2229  ;;  %v2497_v16 = vmax.f32 %v2465_v24, 0.0  ;;  %v2513_v17 = vmax.f32 %v2481_v47, 0.0 }
 0x1ad   : > { %v2348_v56 = vsel %vm2337_vm0, %v4122_v33, %v2246_v23  ;;  %v2340_v2 = vsel %vm2337_vm0, %v4123_v45, %v2230_v27  ;;  %v4128_v27 = vcombine.low %v3643_v35, %v3637_v40 }
 0x1ae   : > { %v2484_v22 = vsub.f32 1.0, %v2452_v3  ;;  %v2468_v29 = vsub.f32 1.0, %v2436_v53  ;;  %v2419_v31 = vsub.f32 %v2348_v56, %v3818_v15  ;;  %v2403_v13 = vsub.f32 %v2340_v2, %v3818_v15  ;;  %2629 = vmatmul.mubr.f32.gmra.mrb[2].mxu0 %v2497_v16  ;;  %2669 = vmatmul.mubr.f32.gmra.mrb[2].mxu1 %v2513_v17 }
 0x1b0   : > { %v2451_v7 = vand.u32 2147483647, %v2419_v31  ;;  %v2435_v0 = vand.u32 2147483647, %v2403_v13  ;;  %v2312_v9 = vpop.permute.xlu1 %2311  ;;  %v2296_v1 = vpop.permute.xlu0 %2295  ;;  %v2500_v14 = vmax.f32 %v2468_v29, 0.0  ;;  %v2516_v49 = vmax.f32 %v2484_v22, 0.0 }
 0x1b1   : > { %v2365_v55 = vsel %vm2337_vm0, %v4124_v41, %v2312_v9  ;;  %v2357_v51 = vsel %vm2337_vm0, %v4125_v57, %v2296_v1  ;;  %v4130_v13 = vcombine.low %v3640_v25, %v3634_v19 }
 0x1b2   : > { %v2483_v52 = vsub.f32 1.0, %v2451_v7  ;;  %v2467_v60 = vsub.f32 1.0, %v2435_v0  ;;  %v2422_v46 = vsub.f32 %v2365_v55, %v3806_v34  ;;  %v2406_v63 = vsub.f32 %v2357_v51, %v3806_v34  ;;  %2633 = vmatprep.mubr.f32.mxu0 %v2500_v14  ;;  %2673 = vmatprep.mubr.f32.mxu1 %v2516_v49 }
 0x1b4   : > { %v2454_v18 = vand.u32 2147483647, %v2422_v46  ;;  %v2438_v26 = vand.u32 2147483647, %v2406_v63  ;;  %v2248_v32 = vpop.permute.xlu1 %2247  ;;  %v2232_v10 = vpop.permute.xlu0 %2231  ;;  %v2499_v61 = vmax.f32 %v2467_v60, 0.0  ;;  %v2515_v21 = vmax.f32 %v2483_v52, 0.0 }
 0x1b5   : > { %v2349_v5 = vsel %vm2337_vm0, %v4126_v28, %v2248_v32  ;;  %v2341_v30 = vsel %vm2337_vm0, %v4127_v12, %v2232_v10  ;;  %v4132_v52 = vld [vmem:[#allocation6_spill] sm:$0xff]  ;;  %v4134_v32 = vld [vmem:[#allocation7_spill] sm:$0xff]  ;;  %v4135_v10 = vld [vmem:[#allocation5_spill] sm:$0xff] }
 0x1b6   : > { %v2486_v20 = vsub.f32 1.0, %v2454_v18  ;;  %v2470_v47 = vsub.f32 1.0, %v2438_v26  ;;  %v2421_v24 = vsub.f32 %v2349_v5, %v3818_v15  ;;  %v2405_v39 = vsub.f32 %v2341_v30, %v3818_v15  ;;  %2634 = vmatmul.mubr.f32.gmra.mrb[4].mxu0 %v2499_v61  ;;  %2674 = vmatmul.mubr.f32.gmra.mrb[4].mxu1 %v2515_v21 }
 0x1b7   : > { %v4133_v48 = vcombine.low %v3678_v43, %v4132_v52  ;;  %v4136_v61 = vcombine.low %v4134_v32, %v4135_v10  ;;  %v4150_v52 = vld [vmem:[#allocation18_spill] sm:$0xff] }
 0x1b8   : > { %v2453_v59 = vand.u32 2147483647, %v2421_v24  ;;  %v2437_v3 = vand.u32 2147483647, %v2405_v39  ;;  %v2314_v53 = vpop.permute.xlu1 %2313  ;;  %v2298_v23 = vpop.permute.xlu0 %2297  ;;  %v2502_v6 = vmax.f32 %v2470_v47, 0.0  ;;  %v2518_v4 = vmax.f32 %v2486_v20, 0.0 }
 0x1b9   : > { %v2366_v62 = vsel %vm2337_vm0, %v4128_v27, %v2314_v53  ;;  %v2358_v16 = vsel %vm2337_vm0, %v4129_v58, %v2298_v23  ;;  %v4137_v24 = vld [vmem:[#allocation8_spill] sm:$0xff]  ;;  %v4138_v39 = vld [vmem:[#allocation10_spill] sm:$0xff]  ;;  %v4141_v27 = vld [vmem:[#allocation9_spill] sm:$0xff] }
 0x1ba   : > { %v2485_v17 = vsub.f32 1.0, %v2453_v59  ;;  %v2469_v33 = vsub.f32 1.0, %v2437_v3  ;;  %v2424_v56 = vsub.f32 %v2366_v62, %v3806_v34  ;;  %v2408_v45 = vsub.f32 %v2358_v16, %v3806_v34  ;;  %2638 = vmatprep.mubr.f32.mxu0 %v2502_v6  ;;  %2678 = vmatprep.mubr.f32.mxu1 %v2518_v4  ;;  %v4140_v4 = vld [vmem:[#allocation11_spill] sm:$0xff] }
 0x1bb   : > { %v4139_v59 = vcombine.low %v4137_v24, %v4138_v39  ;;  %v4142_v62 = vcombine.low %v4140_v4, %v4141_v27 }
 0x1bc   : > { %v2456_v2 = vand.u32 2147483647, %v2424_v56  ;;  %v2440_v22 = vand.u32 2147483647, %v2408_v45  ;;  %v2250_v29 = vpop.permute.xlu1 %2249  ;;  %v2234_v31 = vpop.permute.xlu0 %2233  ;;  %v2501_v40 = vmax.f32 %v2469_v33, 0.0  ;;  %v2517_v35 = vmax.f32 %v2485_v17, 0.0 }
 0x1bd   : > { %v2350_v54 = vsel %vm2337_vm0, %v4130_v13, %v2250_v29  ;;  %v2342_v7 = vsel %vm2337_vm0, %v4131_v11, %v2234_v31  ;;  %v4143_v29 = vld [vmem:[#allocation12_spill] sm:$0xff]  ;;  %v4144_v31 = vld [vmem:[#allocation14_spill] sm:$0xff] }
 0x1be   : > { %v2488_v0 = vsub.f32 1.0, %v2456_v2  ;;  %v2472_v9 = vsub.f32 1.0, %v2440_v22  ;;  %v2423_v1 = vsub.f32 %v2350_v54, %v3818_v15  ;;  %v2407_v14 = vsub.f32 %v2342_v7, %v3818_v15  ;;  %2639 = vmatmul.mubr.f32.gmra.mrb[6].mxu0 %v2501_v40  ;;  %2679 = vmatmul.mubr.f32.gmra.mrb[6].mxu1 %v2517_v35  ;;  %v4146_v7 = vld [vmem:[#allocation15_spill] sm:$0xff] }
 0x1bf   : > { %v4145_v40 = vcombine.low %v4143_v29, %v4144_v31 }
 0x1c0   : > { %v2455_v49 = vand.u32 2147483647, %v2423_v1  ;;  %v2439_v41 = vand.u32 2147483647, %v2407_v14  ;;  %v2504_v55 = vmax.f32 %v2472_v9, 0.0  ;;  %v2520_v57 = vmax.f32 %v2488_v0, 0.0 }
 0x1c1   : > { %v2300_v19 = vpop.permute.xlu0 %2299  ;;  %v4147_v0 = vld [vmem:[#allocation13_spill] sm:$0xff] }
 0x1c2   : > { %v2487_v25 = vsub.f32 1.0, %v2455_v49  ;;  %v2471_v51 = vsub.f32 1.0, %v2439_v41  ;;  %v2359_v42 = vsel %vm2337_vm0, %v4133_v48, %v2300_v19  ;;  %2643 = vmatprep.mubr.f32.mxu0 %v2504_v55  ;;  %2683 = vmatprep.mubr.f32.mxu1 %v2520_v57  ;;  %v4148_v9 = vcombine.low %v4146_v7, %v4147_v0 }
 0x1c3   : > { %v2410_v60 = vsub.f32 %v2359_v42, %v3806_v34 }
 0x1c4   : > { %v2503_v46 = vmax.f32 %v2471_v51, 0.0  ;;  %v2519_v63 = vmax.f32 %v2487_v25, 0.0  ;;  %v4149_v51 = vld [vmem:[#allocation16_spill] sm:$0xff] }
 0x1c5   : > { %v2442_v18 = vand.u32 2147483647, %v2410_v60  ;;  %v2236_v26 = vpop.permute.xlu0 %2235  ;;  %v4151_v48 = vcombine.low %v4149_v51, %v4150_v52 }
 0x1c6   : > { %v2343_v21 = vsel %vm2337_vm0, %v4136_v61, %v2236_v26  ;;  %2644 = vmatmul.mubr.f32.gmra.mrb[8].mxu0 %v2503_v46  ;;  %2684 = vmatmul.mubr.f32.gmra.mrb[8].mxu1 %v2519_v63  ;;  %v4153_v26 = vld [vmem:[#allocation17_spill] sm:$0xff] }
 0x1c7   : > { %v2474_v28 = vsub.f32 1.0, %v2442_v18  ;;  %v2409_v43 = vsub.f32 %v2343_v21, %v3818_v15  ;;  %v4152_v18 = vld [vmem:[#allocation19_spill] sm:$0xff] }
 0x1c8   : > { %v4154_v32 = vcombine.low %v4152_v18, %v4153_v26 }
 0x1c9   : > { %v2441_v5 = vand.u32 2147483647, %v2409_v43  ;;  %v2506_v12 = vmax.f32 %v2474_v28, 0.0 }
 0x1cb   : > { %v2473_v30 = vsub.f32 1.0, %v2441_v5  ;;  %2648 = vmatprep.mubr.f32.mxu0 %v2506_v12 }
 0x1cd   : > { %v2505_v20 = vmax.f32 %v2473_v30, 0.0 }
 0x1cf   : > { %2649 = vmatmul.mubr.f32.gmra.mrb[10].mxu0 %v2505_v20  ;;  %v4155_v20 = vld [vmem:[#allocation20_spill] sm:$0xff] }
 0x1d1   : > { %v2316_v47 = vpop.permute.xlu1 %2315 }
 0x1d2   : > { %v2367_v3 = vsel %vm2337_vm0, %v4139_v59, %v2316_v47  ;;  %v4156_v47 = vld [vmem:[#allocation22_spill] sm:$0xff] }
 0x1d3   : > { %v2426_v53 = vsub.f32 %v2367_v3, %v3806_v34  ;;  %v4157_v24 = vcombine.low %v4155_v20, %v4156_v47 }
 0x1d5   : > { %v2458_v23 = vand.u32 2147483647, %v2426_v53  ;;  %v2252_v6 = vpop.permute.xlu1 %2251 }
 0x1d6   : > { %v2351_v58 = vsel %vm2337_vm0, %v4142_v62, %v2252_v6  ;;  %v4159_v6 = vld [vmem:[#allocation21_spill] sm:$0xff] }
 0x1d7   : > { %v2490_v16 = vsub.f32 1.0, %v2458_v23  ;;  %v2425_v17 = vsub.f32 %v2351_v58, %v3818_v15  ;;  %v4158_v23 = vld [vmem:[#allocation23_spill] sm:$0xff] }
 0x1d8   : > { %v4160_v4 = vcombine.low %v4158_v23, %v4159_v6 }
 0x1d9   : > { %v2457_v33 = vand.u32 2147483647, %v2425_v17  ;;  %v2522_v56 = vmax.f32 %v2490_v16, 0.0 }
 0x1db   : > { %v2489_v45 = vsub.f32 1.0, %v2457_v33  ;;  %2688 = vmatprep.mubr.f32.mxu1 %v2522_v56 }
 0x1dd   : > { %v2521_v2 = vmax.f32 %v2489_v45, 0.0 }
 0x1df   : > { %2689 = vmatmul.mubr.f32.gmra.mrb[10].mxu1 %v2521_v2 }
 0x1e1   : > { %v2302_v22 = vpop.permute.xlu0 %2301 }
 0x1e2   : > { %v2360_v35 = vsel %vm2337_vm0, %v4145_v40, %v2302_v22 }
 0x1e3   : > { %v2412_v13 = vsub.f32 %v2360_v35, %v3806_v34 }
 0x1e5   : > { %v2444_v54 = vand.u32 2147483647, %v2412_v13  ;;  %v2238_v11 = vpop.permute.xlu0 %2237 }
 0x1e6   : > { %v2344_v1 = vsel %vm2337_vm0, %v4148_v9, %v2238_v11 }
 0x1e7   : > { %v2476_v14 = vsub.f32 1.0, %v2444_v54  ;;  %v2411_v49 = vsub.f32 %v2344_v1, %v3818_v15 }
 0x1e9   : > { %v2443_v41 = vand.u32 2147483647, %v2411_v49  ;;  %v2508_v55 = vmax.f32 %v2476_v14, 0.0 }
 0x1eb   : > { %v2475_v57 = vsub.f32 1.0, %v2443_v41  ;;  %2653 = vmatprep.mubr.f32.mxu0 %v2508_v55 }
 0x1ed   : > { %v2507_v19 = vmax.f32 %v2475_v57, 0.0 }
 0x1ef   : > { %2654 = vmatmul.mubr.f32.gmra.mrb[12].mxu0 %v2507_v19 }
 0x1f1   : > { %v2318_v25 = vpop.permute.xlu1 %2317 }
 0x1f2   : > { %v2368_v42 = vsel %vm2337_vm0, %v4151_v48, %v2318_v25 }
 0x1f3   : > { %v2428_v60 = vsub.f32 %v2368_v42, %v3806_v34 }
 0x1f5   : > { %v2460_v46 = vand.u32 2147483647, %v2428_v60  ;;  %v2254_v63 = vpop.permute.xlu1 %2253 }
 0x1f6   : > { %v2352_v10 = vsel %vm2337_vm0, %v4154_v32, %v2254_v63 }
 0x1f7   : > { %v2492_v61 = vsub.f32 1.0, %v2460_v46  ;;  %v2427_v21 = vsub.f32 %v2352_v10, %v3818_v15 }
 0x1f9   : > { %v2459_v28 = vand.u32 2147483647, %v2427_v21  ;;  %v2524_v43 = vmax.f32 %v2492_v61, 0.0 }
 0x1fb   : > { %v2491_v5 = vsub.f32 1.0, %v2459_v28  ;;  %2693 = vmatprep.mubr.f32.mxu1 %v2524_v43 }
 0x1fd   : > { %v2523_v12 = vmax.f32 %v2491_v5, 0.0 }
 0x1ff   : > { %2694 = vmatmul.mubr.f32.gmra.mrb[12].mxu1 %v2523_v12 }
 0x201   : > { %v2304_v30 = vpop.permute.xlu0 %2303 }
 0x202   : > { %v2361_v39 = vsel %vm2337_vm0, %v4157_v24, %v2304_v30 }
 0x203   : > { %v2414_v59 = vsub.f32 %v2361_v39, %v3806_v34 }
 0x205   : > { %v2446_v3 = vand.u32 2147483647, %v2414_v59  ;;  %v2240_v53 = vpop.permute.xlu0 %2239 }
 0x206   : > { %v2345_v27 = vsel %vm2337_vm0, %v4160_v4, %v2240_v53 }
 0x207   : > { %v2478_v62 = vsub.f32 1.0, %v2446_v3  ;;  %v2413_v58 = vsub.f32 %v2345_v27, %v3818_v15 }
 0x209   : > { %v2445_v16 = vand.u32 2147483647, %v2413_v58  ;;  %v2510_v17 = vmax.f32 %v2478_v62, 0.0 }
 0x20b   : > { %v2477_v33 = vsub.f32 1.0, %v2445_v16  ;;  %2658 = vmatprep.mubr.f32.mxu0 %v2510_v17 }
 0x20d   : > { %v2509_v56 = vmax.f32 %v2477_v33, 0.0 }
 0x20f   : > { %2659 = vmatmul.mubr.f32.gmra.mrb[14].mxu0 %v2509_v56 }
 0x211   : > { %v2320_v45 = vpop.permute.xlu1 %2319 }
 0x212   : > { %v2369_v2 = vsel %vm2337_vm0, %v2207_v36, %v2320_v45 }
 0x213   : > { %v2430_v22 = vsub.f32 %v2369_v2, %v3806_v34 }
 0x215   : > { %v2462_v29 = vand.u32 2147483647, %v2430_v22  ;;  %v2256_v31 = vpop.permute.xlu1 %2255 }
 0x216   : > { %v2353_v40 = vsel %vm2337_vm0, %v2205_v38, %v2256_v31 }
 0x217   : > { %v2494_v35 = vsub.f32 1.0, %v2462_v29  ;;  %v2429_v13 = vsub.f32 %v2353_v40, %v3818_v15 }
 0x219   : > { %v2461_v54 = vand.u32 2147483647, %v2429_v13  ;;  %v2526_v11 = vmax.f32 %v2494_v35, 0.0 }
 0x21b   : > { %v2493_v7 = vsub.f32 1.0, %v2461_v54  ;;  %2698 = vmatprep.mubr.f32.mxu1 %v2526_v11 }
 0x21d   : > { %v2525_v0 = vmax.f32 %v2493_v7, 0.0 }
 0x21f   : > { %2699 = vmatmul.mubr.f32.gmra.mrb[14].mxu1 %v2525_v0 }
 0x279   : > { %v2841_v34 = vpop.f32.mrb[0].mxu0  ;;  %v2865_v8 = vpop.f32.mrb[0].mxu1 }
 0x27a   : > { %v2842_v37 = vpop.f32.mrb[1].mxu0  ;;  %v2866_v36 = vpop.f32.mrb[1].mxu1 }
 0x27b   : > { %v2843_v9 = vadd.f32 %v2842_v37, %v2841_v34  ;;  %v2867_v50 = vadd.f32 %v2866_v36, %v2865_v8 }
 0x27d   : > { %2704 = vst [vmem:[%s3997_s8] sm:$0xff] %v2843_v9  ;;  %2712 = vst [vmem:[%s3997_s8 + $0x40] sm:$0xff] %v2867_v50 }
 0x281   : > { %v2844_v15 = vpop.f32.mrb[2].mxu0  ;;  %v2868_v44 = vpop.f32.mrb[2].mxu1 }
 0x282   : > { %v2845_v38 = vpop.f32.mrb[3].mxu0  ;;  %v2869_v1 = vpop.f32.mrb[3].mxu1 }
 0x283   : > { %v2846_v14 = vadd.f32 %v2845_v38, %v2844_v15  ;;  %v2870_v49 = vadd.f32 %v2869_v1, %v2868_v44 }
 0x285   : > { %2705 = vst [vmem:[%s3997_s8 + $0x8] sm:$0xff] %v2846_v14  ;;  %2713 = vst [vmem:[%s3997_s8 + $0x48] sm:$0xff] %v2870_v49 }
 0x289   : > { %v2847_v41 = vpop.f32.mrb[4].mxu0  ;;  %v2871_v55 = vpop.f32.mrb[4].mxu1 }
 0x28a   : > { %v2848_v57 = vpop.f32.mrb[5].mxu0  ;;  %v2872_v19 = vpop.f32.mrb[5].mxu1 }
 0x28b   : > { %v2849_v25 = vadd.f32 %v2848_v57, %v2847_v41  ;;  %v2873_v51 = vadd.f32 %v2872_v19, %v2871_v55 }
 0x28d   : > { %2706 = vst [vmem:[%s3997_s8 + $0x10] sm:$0xff] %v2849_v25  ;;  %2714 = vst [vmem:[%s3997_s8 + $0x50] sm:$0xff] %v2873_v51 }
 0x291   : > { %v2850_v52 = vpop.f32.mrb[6].mxu0  ;;  %v2874_v48 = vpop.f32.mrb[6].mxu1 }
 0x292   : > { %v2851_v42 = vpop.f32.mrb[7].mxu0  ;;  %v2875_v60 = vpop.f32.mrb[7].mxu1 }
 0x293   : > { %v2852_v46 = vadd.f32 %v2851_v42, %v2850_v52  ;;  %v2876_v63 = vadd.f32 %v2875_v60, %v2874_v48 }
 0x295   : > { %2707 = vst [vmem:[%s3997_s8 + $0x18] sm:$0xff] %v2852_v46  ;;  %2715 = vst [vmem:[%s3997_s8 + $0x58] sm:$0xff] %v2876_v63 }
 0x299   : > { %v2853_v18 = vpop.f32.mrb[8].mxu0  ;;  %v2877_v26 = vpop.f32.mrb[8].mxu1 }
 0x29a   : > { %v2854_v32 = vpop.f32.mrb[9].mxu0  ;;  %v2878_v10 = vpop.f32.mrb[9].mxu1 }
 0x29b   : > { %v2855_v61 = vadd.f32 %v2854_v32, %v2853_v18  ;;  %v2879_v21 = vadd.f32 %v2878_v10, %v2877_v26 }
 0x29d   : > { %2708 = vst [vmem:[%s3997_s8 + $0x20] sm:$0xff] %v2855_v61  ;;  %2716 = vst [vmem:[%s3997_s8 + $0x60] sm:$0xff] %v2879_v21 }
 0x2a2   : > { %v2856_v28 = vpop.f32.mrb[10].mxu0 }
 0x2a3   : > { %v2857_v43 = vpop.f32.mrb[11].mxu0 }
 0x2a4   : > { %v2858_v5 = vadd.f32 %v2857_v43, %v2856_v28 }
 0x2a6   : > { %2709 = vst [vmem:[%s3997_s8 + $0x28] sm:$0xff] %v2858_v5 }
 0x2b2   : > { %v2880_v12 = vpop.f32.mrb[10].mxu1 }
 0x2b3   : > { %v2881_v30 = vpop.f32.mrb[11].mxu1 }
 0x2b4   : > { %v2882_v20 = vadd.f32 %v2881_v30, %v2880_v12 }
 0x2b6   : > { %2717 = vst [vmem:[%s3997_s8 + $0x68] sm:$0xff] %v2882_v20 }
 0x2c2   : > { %v2859_v47 = vpop.f32.mrb[12].mxu0 }
 0x2c3   : > { %v2860_v24 = vpop.f32.mrb[13].mxu0 }
 0x2c4   : > { %v2861_v39 = vadd.f32 %v2860_v24, %v2859_v47 }
 0x2c6   : > { %2710 = vst [vmem:[%s3997_s8 + $0x30] sm:$0xff] %v2861_v39 }
 0x2d2   : > { %v2883_v59 = vpop.f32.mrb[12].mxu1 }
 0x2d3   : > { %v2884_v3 = vpop.f32.mrb[13].mxu1 }
 0x2d4   : > { %v2885_v53 = vadd.f32 %v2884_v3, %v2883_v59 }
 0x2d6   : > { %2718 = vst [vmem:[%s3997_s8 + $0x70] sm:$0xff] %v2885_v53 }
 0x2e2   : > { %v2862_v23 = vpop.f32.mrb[14].mxu0 }
 0x2e3   : > { %v2863_v6 = vpop.f32.mrb[15].mxu0 }
 0x2e4   : > { %v2864_v4 = vadd.f32 %v2863_v6, %v2862_v23 }
 0x2e6   : > { %2711 = vst [vmem:[%s3997_s8 + $0x38] sm:$0xff] %v2864_v4 }
 0x2f2   : > { %v2886_v27 = vpop.f32.mrb[14].mxu1 }
 0x2f3   : > { %v2887_v62 = vpop.f32.mrb[15].mxu1 }
 0x2f4   : > { %v2888_v58 = vadd.f32 %v2887_v62, %v2886_v27 }
 0x2f6   : > { %2719 = vst [vmem:[%s3997_s8 + $0x78] sm:$0xff] %v2888_v58 }
 0x2f7   : > { %2994 = shalt.err (!%p2991_p3)
}
 0x2f8   : > { %s2995_s27 = scalar_lea.hbm %s4019_s22, 2048  ;;  %s2999_s30 = scalar_lea.hbm %s4069_s2, 4096 }
 0x2f9   : > { %p2996_p4 = scmp.ne.s32.totalorder %s4019_s22, %s2995_s27  ;;  %p3000_p9 = scmp.lt.u32.totalorder %s4019_s22, %s4069_s2 }
 0x2fa   : > { %p3001_p10 = scmp.lt.u32.totalorder %s2999_s30, %s2995_s27  ;;  %p3003_p12 = scmp.lt.u32.totalorder %s2995_s27, %s4019_s22 }
 0x2fb   : > { %p2997_p7 = pnand %p2996_p4, %p3104_p5 }
 0x2fc   : > { %p3002_p11 = por %p3001_p10, %p3000_p9 }
 0x2fd   : > { %p2998_p8 = pneg %p2997_p7 }
 0x2fe   : > { %p3004_p13 = por %p3003_p12, %p3002_p11 }
 0x300   : > { %p3005_p0 = pnand %p3004_p13, %p2998_p8 }
 0x302   : > { %3008 = shalt.err (!%p3005_p0)
}
 0x303   : > { %s3049_s5 = smov 128   ;;  %s3050_s6 = smov 8  }
 0x304   : > { %2937 = dma.vmem_to_hbm [thread:$0]  (%p3104_p5), %s4021_s16, 2048, %s4019_s22, %s4026_s23, %s3049_s5, %s3049_s5, %s3050_s6  }
 0x305 PF: > { %p2943_p1 = scmp.ge.s32.totalorder %s3043_s12, 2  ;;  %s2749_s7 = sand.u32 1, %s3031_s9  }
 0x306   : > { %s2750_s8 = scalar_lea.sflag [#allocation3], %s2749_s7 }
 0x307   : > { %p2940_p2 = pnand %p2943_p1, %p3108_p6 }
 0x309   : > { %3026 = dma.done.wait (!%p2940_p2), %s2750_s8, 2048  }
 0x30a   : > { %3028 = vsyncadd (!%p2940_p2), %s2750_s8, 4294965248  ;;  %p12_p3 = scmp.ge.s32.totalorder %s3091_s15, 4   ;;  %s4161_s9 = smov %s3035_s10 }
 0x30b   : > { %s4162_s10 = smov %s3039_s11  ;;  %s4163_s11 = smov %s3102_s18 }
 0x30c   : > { %s4164_s12 = smov %s3091_s15  ;;  %14 = sbr.rel (!%p12_p3) target bundleno = 3 (0x3), region = 63 }
 0x313   :  { %2755 = vsyncpa [#allocation3], 1 }
 0x314   :  { %2757 = vsyncpa [#allocation3 + $0x1], 1 }

</bundles_post_ra>
